<compile_context>
chip_gen: v5e
topology: v5e:2x2
jax: 0.10.0
libtpu: 0.0.40
codegen_flags: <defaults>
</compile_context>

<pallas_src>
import functools

import jax
import jax.numpy as jnp
from jax.experimental import pallas as pl
from jax.experimental.pallas import tpu as pltpu

LANE = 128


def _round_up(x, m):
    return ((x + m - 1) // m) * m


def _vmem_capacity_bytes():
    try:
        info = pltpu.get_tpu_info()
        cap = getattr(info, "vmem_capacity_bytes", None)
        if cap:
            return int(cap)
    except Exception:
        pass
    return 64 * 2 ** 20  # conservative default = v7x per-TensorCore VMEM


# -----------------------------------------------------------------------------
# Pallas kernels: fused (im2col-matmul) + bias + ReLU (+ optional residual)
# BN scale is pre-folded into the weights, so the epilogue is add+relu only.
# -----------------------------------------------------------------------------
def _matmul_bias_relu_kernel(cols_ref, w_ref, bias_ref, o_ref):
    acc = jnp.dot(cols_ref[...], w_ref[...], preferred_element_type=jnp.float32)
    o_ref[...] = jnp.maximum(acc + bias_ref[...], 0.0).astype(o_ref.dtype)


def _matmul_bias_relu_res_kernel(cols_ref, w_ref, bias_ref, res_ref, o_ref):
    acc = jnp.dot(cols_ref[...], w_ref[...], preferred_element_type=jnp.float32)
    y = jnp.maximum(acc + bias_ref[...], 0.0)
    o_ref[...] = (y + res_ref[...].astype(jnp.float32)).astype(o_ref.dtype)


def _choose_tile_hw(hw, kkc, cpad, has_res, vmem_cap):
    """Pick an HW tile: large enough to amortize the ~0.35us/step pipeline
    overhead, small enough that double-buffered streaming blocks stay within
    ~1/4 of VMEM, and (whenever possible) an exact divisor of HW so the
    9x-sized patch matrix never needs padding.  Returns (tile_hw, hw_padded)."""
    out_row = cpad * 2 * (2 if has_res else 1)      # bf16 out (+ bf16 residual)
    row_bytes = 2 * (kkc * 2 + out_row)             # double-buffered streams
    resident = kkc * cpad * 2 + cpad * 4            # weights + bias stay put
    budget = max(vmem_cap // 4 - resident, row_bytes * 256)
    hard_cap = 4096 if vmem_cap > 96 * 2 ** 20 else 2048   # v5e/v6e vs v7x
    max_tile = max(256, min(hard_cap, budget // row_bytes))
    if hw <= max_tile:
        return hw, hw                               # single tile, no padding
    for step in (128, 8):                           # largest divisor <= max_tile
        t = (max_tile // step) * step
        while t >= step:
            if hw % t == 0:
                return t, hw
            t -= step
    # Fallback (essentially unreachable for real image sizes): pad HW.
    tile = max(16, (max_tile // 16) * 16)
    return tile, _round_up(hw, tile)


def fused_matmul_bias_relu(cols, wmat, bias, residual=None):
    """cols: (N, HW, KKC) bf16 patch matrix; wmat: (KKC, Cout) f32 with BN
    scale folded in; bias: (1, Cout) f32; residual: optional (N, HW, Cout)
    bf16.  Returns relu(cols @ wmat + bias) [+ residual] as (N, HW, Cout) bf16."""
    N, HW, KKC = cols.shape
    Cout = wmat.shape[1]
    lane = 256 if Cout > 128 else LANE   # fill the 256-wide MXU on v6e/v7x
    Cpad = _round_up(Cout, lane)
    vmem_cap = _vmem_capacity_bytes()

    # Zero-padded weight columns / bias -> padded output channels are exactly 0.
    if Cpad != Cout:
        wmat = jnp.pad(wmat, ((0, 0), (0, Cpad - Cout)))
        bias = jnp.pad(bias, ((0, 0), (0, Cpad - Cout)))
        if residual is not None:
            residual = jnp.pad(residual, ((0, 0), (0, 0), (0, Cpad - Cout)))

    TILE_HW, HW_pad = _choose_tile_hw(HW, KKC, Cpad, residual is not None, vmem_cap)
    if HW_pad != HW:   # rare fallback path only
        cols = jnp.pad(cols, ((0, 0), (0, HW_pad - HW), (0, 0)))
        if residual is not None:
            residual = jnp.pad(residual, ((0, 0), (0, HW_pad - HW), (0, 0)))
    T = HW_pad // TILE_HW

    wmat = wmat.astype(jnp.bfloat16)     # small tensor; cast once per layer
    bias = bias.astype(jnp.float32)

    in_specs = [
        pl.BlockSpec((None, TILE_HW, KKC), lambda b, t: (b, t, 0)),  # patch tile
        pl.BlockSpec((KKC, Cpad), lambda b, t: (0, 0)),              # weights (resident)
        pl.BlockSpec((1, Cpad), lambda b, t: (0, 0)),                # bias (resident)
    ]
    args = [cols, wmat, bias]
    res_blk = 0
    if residual is not None:
        in_specs.append(pl.BlockSpec((None, TILE_HW, Cpad), lambda b, t: (b, t, 0)))
        args.append(residual.astype(jnp.bfloat16))
        kernel = _matmul_bias_relu_res_kernel
        res_blk = TILE_HW * Cpad * 2
    else:
        kernel = _matmul_bias_relu_kernel

    # Explicit VMEM budget: double-buffered streaming blocks + resident weights,
    # clamped under physical capacity (v7x = 64 MiB per TensorCore).
    blk_bytes = (2 * (TILE_HW * KKC * 2 + TILE_HW * Cpad * 2 + res_blk)
                 + KKC * Cpad * 2 + Cpad * 4)
    vmem_limit = int(max(min(int(0.8 * vmem_cap), max(32 * 2 ** 20, 4 * blk_bytes)),
                         2 * blk_bytes))

    flops = 2 * N * HW_pad * KKC * Cpad
    bytes_accessed = (N * HW_pad * KKC * 2 + KKC * Cpad * 2 + Cpad * 4
                      + N * HW_pad * Cpad * 2 * (2 if residual is not None else 1))

    out = pl.pallas_call(
        kernel,
        out_shape=jax.ShapeDtypeStruct((N, HW_pad, Cpad), jnp.bfloat16),
        grid=(N, T),
        in_specs=in_specs,
        out_specs=pl.BlockSpec((None, TILE_HW, Cpad), lambda b, t: (b, t, 0)),
        compiler_params=pltpu.CompilerParams(
            dimension_semantics=("parallel", "parallel"),
            vmem_limit_bytes=vmem_limit,
        ),
        cost_estimate=pl.CostEstimate(
            flops=flops, transcendentals=0, bytes_accessed=bytes_accessed),
    )(*args)

    if HW_pad != HW or Cpad != Cout:
        out = out[:, :HW, :Cout]
    return out


# -----------------------------------------------------------------------------
# JAX glue: bf16 im2col, maxpool (ceil_mode), PyTorch-style bilinear resize
# -----------------------------------------------------------------------------
def conv_bn_relu(x, p, dilation=1, residual=None):
    """x: (N, H, W, Cin) NHWC.  3x3 conv (static `dilation`), folded eval-mode
    BN and ReLU via the Pallas kernel.  `residual` (NHWC) is fused in-kernel.
    Patches are built directly in bf16 (single HBM write of the 9x matrix)."""
    N, H, W, Cin = x.shape
    d = int(dilation)          # static Python int; k=3 => padding == dilation
    xb = x.astype(jnp.bfloat16)
    xp = jnp.pad(xb, ((0, 0), (d, d), (d, d), (0, 0)))
    patches = [
        xp[:, dy * d:dy * d + H, dx * d:dx * d + W, :]
        for dy in range(3) for dx in range(3)
    ]
    cols = jnp.concatenate(patches, axis=-1).reshape(N, H * W, 9 * Cin)
    res = None
    if residual is not None:
        res = residual.astype(jnp.bfloat16).reshape(N, H * W, residual.shape[-1])
    Cout = p["w"].shape[1]
    out = fused_matmul_bias_relu(cols, p["w"], p["bias"], res)
    return out.reshape(N, H, W, Cout)


def maxpool2x2_ceil(x):
    """MaxPool2d(kernel_size=2, stride=2, ceil_mode=True) on NHWC."""
    N, H, W, C = x.shape
    Ho, Wo = -(-H // 2), -(-W // 2)
    xp = jnp.pad(
        x,
        ((0, 0), (0, Ho * 2 - H), (0, Wo * 2 - W), (0, 0)),
        constant_values=-jnp.inf,
    )
    return xp.reshape(N, Ho, 2, Wo, 2, C).max(axis=(2, 4))


def bilinear_resize(x, Ho, Wo):
    """F.interpolate(mode='bilinear', align_corners=False) on NHWC."""
    N, H, W, C = x.shape
    if H == Ho and W == Wo:
        return x
    ys = jnp.maximum((jnp.arange(Ho, dtype=jnp.float32) + 0.5) * (H / Ho) - 0.5, 0.0)
    xs = jnp.maximum((jnp.arange(Wo, dtype=jnp.float32) + 0.5) * (W / Wo) - 0.5, 0.0)
    y0 = jnp.floor(ys).astype(jnp.int32)
    x0 = jnp.floor(xs).astype(jnp.int32)
    y1 = jnp.minimum(y0 + 1, H - 1)
    x1 = jnp.minimum(x0 + 1, W - 1)
    wy = (ys - y0)[None, :, None, None]
    wx = (xs - x0)[None, None, :, None]
    r0 = jnp.take(x, y0, axis=1)
    r1 = jnp.take(x, y1, axis=1)
    a = jnp.take(r0, x0, axis=2)
    b = jnp.take(r0, x1, axis=2)
    c = jnp.take(r1, x0, axis=2)
    e = jnp.take(r1, x1, axis=2)
    top = a * (1.0 - wx) + b * wx
    bot = c * (1.0 - wx) + e * wx
    return (top * (1.0 - wy) + bot * wy).astype(x.dtype)


# -----------------------------------------------------------------------------
# Deterministic parameter construction (ConvBNReLU -> scale folded into W)
# -----------------------------------------------------------------------------
def make_cbr_params(key, cin, cout, eps=1e-5):
    k1, k2, k3, k4, k5 = jax.random.split(key, 5)
    w = jax.random.normal(k1, (3, 3, cin, cout), jnp.float32) / (3.0 * jnp.sqrt(cin))
    gamma = jax.random.uniform(k2, (cout,), jnp.float32, 0.5, 1.5)
    beta = 0.1 * jax.random.normal(k3, (cout,), jnp.float32)
    mean = 0.1 * jax.random.normal(k4, (cout,), jnp.float32)
    var = jax.random.uniform(k5, (cout,), jnp.float32, 0.5, 1.5)
    scale = gamma / jnp.sqrt(var + eps)
    bias = beta - mean * scale
    # Fold eval-mode BN scale into the conv weight columns; the Pallas kernel
    # epilogue is then only relu(acc + bias) (+ fused residual).
    w_scaled = w.reshape(9 * cin, cout) * scale[None, :]   # (dy, dx, cin) rows
    return {"w": w_scaled, "bias": bias.reshape(1, cout)}


def init_rsu_params(key, height, in_ch, mid_ch, out_ch):
    assert height >= 2
    keys = list(jax.random.split(key, 2 * height + 2))
    it = iter(keys)
    params = {"conv_in": make_cbr_params(next(it), in_ch, out_ch)}
    enc = [make_cbr_params(next(it), out_ch, mid_ch)]               # no downsample
    dec = [make_cbr_params(next(it), mid_ch * 2, mid_ch)]           # no upsample
    for i in range(height - 2):
        enc.append(make_cbr_params(next(it), mid_ch, mid_ch))       # with maxpool
        dec.append(make_cbr_params(
            next(it), mid_ch * 2, mid_ch if i < height - 3 else out_ch))  # with upsample
    enc.append(make_cbr_params(next(it), mid_ch, mid_ch))           # dilated (d=2) conv
    params["enc"] = enc
    params["dec"] = dec
    return params


# -----------------------------------------------------------------------------
# RSU forward (matches the PyTorch module's forward)
# -----------------------------------------------------------------------------
def rsu_forward(x_nchw, params, height):
    x = jnp.transpose(x_nchw, (0, 2, 3, 1))        # NCHW -> NHWC
    x_in = conv_bn_relu(x, params["conv_in"], dilation=1)

    h = x_in
    enc_outputs = []
    # encoder 0: no pooling
    h = conv_bn_relu(h, params["enc"][0], dilation=1)
    enc_outputs.append(h)
    # encoders 1 .. height-2: maxpool then conv
    for i in range(1, height - 1):
        h = maxpool2x2_ceil(h)
        h = conv_bn_relu(h, params["enc"][i], dilation=1)
        enc_outputs.append(h)
    # last encoder: dilated conv, no pooling
    h = conv_bn_relu(h, params["enc"][height - 1], dilation=2)
    enc_outputs.append(h)

    h = enc_outputs.pop()
    n_dec = height - 1
    for j in range(n_dec):
        x2 = enc_outputs.pop()
        if j > 0:  # decoders after the first upsample to the skip's spatial size
            h = bilinear_resize(h, x2.shape[1], x2.shape[2])
        cat = jnp.concatenate([h, x2], axis=-1)
        residual = x_in if j == n_dec - 1 else None   # final `x + x_in` fused in kernel
        h = conv_bn_relu(cat, params["dec"][j], dilation=1, residual=residual)

    return jnp.transpose(h, (0, 3, 1, 2)).astype(jnp.float32)   # NHWC -> NCHW


if __name__ == "__main__":
    HEIGHT, IN_CH, MID_CH, OUT_CH = 4, 4, 8, 4
    N, H, W = 2, 16, 16

    x = jax.random.normal(jax.random.PRNGKey(0), (N, IN_CH, H, W), jnp.float32)
    params = init_rsu_params(jax.random.PRNGKey(1), HEIGHT, IN_CH, MID_CH, OUT_CH)

    run = jax.jit(functools.partial(rsu_forward, height=HEIGHT))
    y = run(x, params)
    jax.block_until_ready(y)

    assert y.shape == (N, OUT_CH, H, W), y.shape
    assert bool(jnp.all(jnp.isfinite(y)))
    print("KERNEL_OK")
</pallas_src>

<mosaic_0001>
module attributes {stable_mosaic.version = 11 : i64} {
  func.func @_matmul_bias_relu_kernel(%arg0: i32, %arg1: i32, %arg2: memref<1x256x36xbf16, #tpu.memory_space<vmem>>, %arg3: memref<36x128xbf16, #tpu.memory_space<vmem>>, %arg4: memref<1x128xf32, #tpu.memory_space<vmem>>, %arg5: memref<1x256x128xbf16, #tpu.memory_space<vmem>>) attributes {dimension_semantics = [#tpu.dimension_semantics<parallel>, #tpu.dimension_semantics<parallel>], iteration_bounds = array<i64: 2, 1>, scalar_prefetch = 0 : i64, scratch_operands = 0 : i64, tpu.core_type = #tpu.core_type<tc>, window_params = [{transform_indices = @transform_0, window_bounds = array<i64: 1, 256, 36>}, {pipeline_mode = #tpu.pipeline_mode<synchronous>, transform_indices = @transform_1, window_bounds = array<i64: 36, 128>}, {pipeline_mode = #tpu.pipeline_mode<synchronous>, transform_indices = @transform_2, window_bounds = array<i64: 1, 128>}, {transform_indices = @transform_3, window_bounds = array<i64: 1, 256, 128>}]} {
    %c0 = arith.constant 0 : index
    %c0_0 = arith.constant 0 : index
    %c0_1 = arith.constant 0 : index
    %0 = vector.load %arg2[%c0, %c0_0, %c0_1] : memref<1x256x36xbf16, #tpu.memory_space<vmem>>, vector<1x256x36xbf16>
    %1 = vector.shape_cast %0 : vector<1x256x36xbf16> to vector<256x36xbf16>
    %c0_2 = arith.constant 0 : index
    %c0_3 = arith.constant 0 : index
    %2 = vector.load %arg3[%c0_2, %c0_3] : memref<36x128xbf16, #tpu.memory_space<vmem>>, vector<36x128xbf16>
    %cst = arith.constant dense<0.000000e+00> : vector<256x128xf32>
    %3 = tpu.matmul %1, %2, %cst {dimension_numbers = #tpu.dot_dimension_numbers<[1], [0], [0], [1], [0, 0, 1, 1], [], []>} : vector<256x36xbf16>, vector<36x128xbf16>, vector<256x128xf32> -> vector<256x128xf32>
    %c0_4 = arith.constant 0 : index
    %c0_5 = arith.constant 0 : index
    %4 = vector.load %arg4[%c0_4, %c0_5] : memref<1x128xf32, #tpu.memory_space<vmem>>, vector<1x128xf32>
    %5 = vector.broadcast %4 : vector<1x128xf32> to vector<256x128xf32>
    %6 = arith.addf %3, %5 : vector<256x128xf32>
    %cst_6 = arith.constant 0.000000e+00 : f32
    %7 = vector.broadcast %cst_6 : f32 to vector<256x128xf32>
    %8 = arith.maximumf %6, %7 : vector<256x128xf32>
    %9 = arith.truncf %8 : vector<256x128xf32> to vector<256x128xbf16>
    %c0_7 = arith.constant 0 : index
    %c0_8 = arith.constant 0 : index
    %c0_9 = arith.constant 0 : index
    %10 = vector.load %arg5[%c0_7, %c0_8, %c0_9] : memref<1x256x128xbf16, #tpu.memory_space<vmem>>, vector<1x256x128xbf16>
    %11 = vector.shape_cast %10 : vector<1x256x128xbf16> to vector<256x128xbf16>
    %12 = vector.shape_cast %9 : vector<256x128xbf16> to vector<1x256x128xbf16>
    tpu.vector_store %arg5[%c0_7, %c0_8, %c0_9], %12 {strides = array<i32>} : memref<1x256x128xbf16, #tpu.memory_space<vmem>>, vector<1x256x128xbf16>,
    return
  }
  func.func @transform_0(%arg0: i32, %arg1: i32) -> (i32, i32, i32) {
    %c0_i32 = arith.constant 0 : i32
    %c0_i32_0 = arith.constant 0 : i32
    return %arg0, %arg1, %c0_i32 : i32, i32, i32
  }
  func.func @transform_1(%arg0: i32, %arg1: i32) -> (i32, i32) {
    %c0_i32 = arith.constant 0 : i32
    %c0_i32_0 = arith.constant 0 : i32
    %c0_i32_1 = arith.constant 0 : i32
    return %c0_i32, %c0_i32_0 : i32, i32
  }
  func.func @transform_2(%arg0: i32, %arg1: i32) -> (i32, i32) {
    %c0_i32 = arith.constant 0 : i32
    %c0_i32_0 = arith.constant 0 : i32
    %c0_i32_1 = arith.constant 0 : i32
    return %c0_i32, %c0_i32_0 : i32, i32
  }
  func.func @transform_3(%arg0: i32, %arg1: i32) -> (i32, i32, i32) {
    %c0_i32 = arith.constant 0 : i32
    %c0_i32_0 = arith.constant 0 : i32
    return %arg0, %arg1, %c0_i32 : i32, i32, i32
  }
}

module attributes {stable_mosaic.version = 11 : i64} {
  func.func @_matmul_bias_relu_kernel(%arg0: i32, %arg1: i32, %arg2: memref<1x64x72xbf16, #tpu.memory_space<vmem>>, %arg3: memref<72x128xbf16, #tpu.memory_space<vmem>>, %arg4: memref<1x128xf32, #tpu.memory_space<vmem>>, %arg5: memref<1x64x128xbf16, #tpu.memory_space<vmem>>) attributes {dimension_semantics = [#tpu.dimension_semantics<parallel>, #tpu.dimension_semantics<parallel>], iteration_bounds = array<i64: 2, 1>, scalar_prefetch = 0 : i64, scratch_operands = 0 : i64, tpu.core_type = #tpu.core_type<tc>, window_params = [{transform_indices = @transform_0, window_bounds = array<i64: 1, 64, 72>}, {pipeline_mode = #tpu.pipeline_mode<synchronous>, transform_indices = @transform_1, window_bounds = array<i64: 72, 128>}, {pipeline_mode = #tpu.pipeline_mode<synchronous>, transform_indices = @transform_2, window_bounds = array<i64: 1, 128>}, {transform_indices = @transform_3, window_bounds = array<i64: 1, 64, 128>}]} {
    %c0 = arith.constant 0 : index
    %c0_0 = arith.constant 0 : index
    %c0_1 = arith.constant 0 : index
    %0 = vector.load %arg2[%c0, %c0_0, %c0_1] : memref<1x64x72xbf16, #tpu.memory_space<vmem>>, vector<1x64x72xbf16>
    %1 = vector.shape_cast %0 : vector<1x64x72xbf16> to vector<64x72xbf16>
    %c0_2 = arith.constant 0 : index
    %c0_3 = arith.constant 0 : index
    %2 = vector.load %arg3[%c0_2, %c0_3] : memref<72x128xbf16, #tpu.memory_space<vmem>>, vector<72x128xbf16>
    %cst = arith.constant dense<0.000000e+00> : vector<64x128xf32>
    %3 = tpu.matmul %1, %2, %cst {dimension_numbers = #tpu.dot_dimension_numbers<[1], [0], [0], [1], [0, 0, 1, 1], [], []>} : vector<64x72xbf16>, vector<72x128xbf16>, vector<64x128xf32> -> vector<64x128xf32>
    %c0_4 = arith.constant 0 : index
    %c0_5 = arith.constant 0 : index
    %4 = vector.load %arg4[%c0_4, %c0_5] : memref<1x128xf32, #tpu.memory_space<vmem>>, vector<1x128xf32>
    %5 = vector.broadcast %4 : vector<1x128xf32> to vector<64x128xf32>
    %6 = arith.addf %3, %5 : vector<64x128xf32>
    %cst_6 = arith.constant 0.000000e+00 : f32
    %7 = vector.broadcast %cst_6 : f32 to vector<64x128xf32>
    %8 = arith.maximumf %6, %7 : vector<64x128xf32>
    %9 = arith.truncf %8 : vector<64x128xf32> to vector<64x128xbf16>
    %c0_7 = arith.constant 0 : index
    %c0_8 = arith.constant 0 : index
    %c0_9 = arith.constant 0 : index
    %10 = vector.load %arg5[%c0_7, %c0_8, %c0_9] : memref<1x64x128xbf16, #tpu.memory_space<vmem>>, vector<1x64x128xbf16>
    %11 = vector.shape_cast %10 : vector<1x64x128xbf16> to vector<64x128xbf16>
    %12 = vector.shape_cast %9 : vector<64x128xbf16> to vector<1x64x128xbf16>
    tpu.vector_store %arg5[%c0_7, %c0_8, %c0_9], %12 {strides = array<i32>} : memref<1x64x128xbf16, #tpu.memory_space<vmem>>, vector<1x64x128xbf16>,
    return
  }
  func.func @transform_0(%arg0: i32, %arg1: i32) -> (i32, i32, i32) {
    %c0_i32 = arith.constant 0 : i32
    %c0_i32_0 = arith.constant 0 : i32
    return %arg0, %arg1, %c0_i32 : i32, i32, i32
  }
  func.func @transform_1(%arg0: i32, %arg1: i32) -> (i32, i32) {
    %c0_i32 = arith.constant 0 : i32
    %c0_i32_0 = arith.constant 0 : i32
    %c0_i32_1 = arith.constant 0 : i32
    return %c0_i32, %c0_i32_0 : i32, i32
  }
  func.func @transform_2(%arg0: i32, %arg1: i32) -> (i32, i32) {
    %c0_i32 = arith.constant 0 : i32
    %c0_i32_0 = arith.constant 0 : i32
    %c0_i32_1 = arith.constant 0 : i32
    return %c0_i32, %c0_i32_0 : i32, i32
  }
  func.func @transform_3(%arg0: i32, %arg1: i32) -> (i32, i32, i32) {
    %c0_i32 = arith.constant 0 : i32
    %c0_i32_0 = arith.constant 0 : i32
    return %arg0, %arg1, %c0_i32 : i32, i32, i32
  }
}

module attributes {stable_mosaic.version = 11 : i64} {
  func.func @_matmul_bias_relu_kernel(%arg0: i32, %arg1: i32, %arg2: memref<1x16x72xbf16, #tpu.memory_space<vmem>>, %arg3: memref<72x128xbf16, #tpu.memory_space<vmem>>, %arg4: memref<1x128xf32, #tpu.memory_space<vmem>>, %arg5: memref<1x16x128xbf16, #tpu.memory_space<vmem>>) attributes {dimension_semantics = [#tpu.dimension_semantics<parallel>, #tpu.dimension_semantics<parallel>], iteration_bounds = array<i64: 2, 1>, scalar_prefetch = 0 : i64, scratch_operands = 0 : i64, tpu.core_type = #tpu.core_type<tc>, window_params = [{transform_indices = @transform_0, window_bounds = array<i64: 1, 16, 72>}, {pipeline_mode = #tpu.pipeline_mode<synchronous>, transform_indices = @transform_1, window_bounds = array<i64: 72, 128>}, {pipeline_mode = #tpu.pipeline_mode<synchronous>, transform_indices = @transform_2, window_bounds = array<i64: 1, 128>}, {transform_indices = @transform_3, window_bounds = array<i64: 1, 16, 128>}]} {
    %c0 = arith.constant 0 : index
    %c0_0 = arith.constant 0 : index
    %c0_1 = arith.constant 0 : index
    %0 = vector.load %arg2[%c0, %c0_0, %c0_1] : memref<1x16x72xbf16, #tpu.memory_space<vmem>>, vector<1x16x72xbf16>
    %1 = vector.shape_cast %0 : vector<1x16x72xbf16> to vector<16x72xbf16>
    %c0_2 = arith.constant 0 : index
    %c0_3 = arith.constant 0 : index
    %2 = vector.load %arg3[%c0_2, %c0_3] : memref<72x128xbf16, #tpu.memory_space<vmem>>, vector<72x128xbf16>
    %cst = arith.constant dense<0.000000e+00> : vector<16x128xf32>
    %3 = tpu.matmul %1, %2, %cst {dimension_numbers = #tpu.dot_dimension_numbers<[1], [0], [0], [1], [0, 0, 1, 1], [], []>} : vector<16x72xbf16>, vector<72x128xbf16>, vector<16x128xf32> -> vector<16x128xf32>
    %c0_4 = arith.constant 0 : index
    %c0_5 = arith.constant 0 : index
    %4 = vector.load %arg4[%c0_4, %c0_5] : memref<1x128xf32, #tpu.memory_space<vmem>>, vector<1x128xf32>
    %5 = vector.broadcast %4 : vector<1x128xf32> to vector<16x128xf32>
    %6 = arith.addf %3, %5 : vector<16x128xf32>
    %cst_6 = arith.constant 0.000000e+00 : f32
    %7 = vector.broadcast %cst_6 : f32 to vector<16x128xf32>
    %8 = arith.maximumf %6, %7 : vector<16x128xf32>
    %9 = arith.truncf %8 : vector<16x128xf32> to vector<16x128xbf16>
    %c0_7 = arith.constant 0 : index
    %c0_8 = arith.constant 0 : index
    %c0_9 = arith.constant 0 : index
    %10 = vector.load %arg5[%c0_7, %c0_8, %c0_9] : memref<1x16x128xbf16, #tpu.memory_space<vmem>>, vector<1x16x128xbf16>
    %11 = vector.shape_cast %10 : vector<1x16x128xbf16> to vector<16x128xbf16>
    %12 = vector.shape_cast %9 : vector<16x128xbf16> to vector<1x16x128xbf16>
    tpu.vector_store %arg5[%c0_7, %c0_8, %c0_9], %12 {strides = array<i32>} : memref<1x16x128xbf16, #tpu.memory_space<vmem>>, vector<1x16x128xbf16>,
    return
  }
  func.func @transform_0(%arg0: i32, %arg1: i32) -> (i32, i32, i32) {
    %c0_i32 = arith.constant 0 : i32
    %c0_i32_0 = arith.constant 0 : i32
    return %arg0, %arg1, %c0_i32 : i32, i32, i32
  }
  func.func @transform_1(%arg0: i32, %arg1: i32) -> (i32, i32) {
    %c0_i32 = arith.constant 0 : i32
    %c0_i32_0 = arith.constant 0 : i32
    %c0_i32_1 = arith.constant 0 : i32
    return %c0_i32, %c0_i32_0 : i32, i32
  }
  func.func @transform_2(%arg0: i32, %arg1: i32) -> (i32, i32) {
    %c0_i32 = arith.constant 0 : i32
    %c0_i32_0 = arith.constant 0 : i32
    %c0_i32_1 = arith.constant 0 : i32
    return %c0_i32, %c0_i32_0 : i32, i32
  }
  func.func @transform_3(%arg0: i32, %arg1: i32) -> (i32, i32, i32) {
    %c0_i32 = arith.constant 0 : i32
    %c0_i32_0 = arith.constant 0 : i32
    return %arg0, %arg1, %c0_i32 : i32, i32, i32
  }
}

module attributes {stable_mosaic.version = 11 : i64} {
  func.func @_matmul_bias_relu_kernel(%arg0: i32, %arg1: i32, %arg2: memref<1x16x144xbf16, #tpu.memory_space<vmem>>, %arg3: memref<144x128xbf16, #tpu.memory_space<vmem>>, %arg4: memref<1x128xf32, #tpu.memory_space<vmem>>, %arg5: memref<1x16x128xbf16, #tpu.memory_space<vmem>>) attributes {dimension_semantics = [#tpu.dimension_semantics<parallel>, #tpu.dimension_semantics<parallel>], iteration_bounds = array<i64: 2, 1>, scalar_prefetch = 0 : i64, scratch_operands = 0 : i64, tpu.core_type = #tpu.core_type<tc>, window_params = [{transform_indices = @transform_0, window_bounds = array<i64: 1, 16, 144>}, {pipeline_mode = #tpu.pipeline_mode<synchronous>, transform_indices = @transform_1, window_bounds = array<i64: 144, 128>}, {pipeline_mode = #tpu.pipeline_mode<synchronous>, transform_indices = @transform_2, window_bounds = array<i64: 1, 128>}, {transform_indices = @transform_3, window_bounds = array<i64: 1, 16, 128>}]} {
    %c0 = arith.constant 0 : index
    %c0_0 = arith.constant 0 : index
    %c0_1 = arith.constant 0 : index
    %0 = vector.load %arg2[%c0, %c0_0, %c0_1] : memref<1x16x144xbf16, #tpu.memory_space<vmem>>, vector<1x16x144xbf16>
    %1 = vector.shape_cast %0 : vector<1x16x144xbf16> to vector<16x144xbf16>
    %c0_2 = arith.constant 0 : index
    %c0_3 = arith.constant 0 : index
    %2 = vector.load %arg3[%c0_2, %c0_3] : memref<144x128xbf16, #tpu.memory_space<vmem>>, vector<144x128xbf16>
    %cst = arith.constant dense<0.000000e+00> : vector<16x128xf32>
    %3 = tpu.matmul %1, %2, %cst {dimension_numbers = #tpu.dot_dimension_numbers<[1], [0], [0], [1], [0, 0, 1, 1], [], []>} : vector<16x144xbf16>, vector<144x128xbf16>, vector<16x128xf32> -> vector<16x128xf32>
    %c0_4 = arith.constant 0 : index
    %c0_5 = arith.constant 0 : index
    %4 = vector.load %arg4[%c0_4, %c0_5] : memref<1x128xf32, #tpu.memory_space<vmem>>, vector<1x128xf32>
    %5 = vector.broadcast %4 : vector<1x128xf32> to vector<16x128xf32>
    %6 = arith.addf %3, %5 : vector<16x128xf32>
    %cst_6 = arith.constant 0.000000e+00 : f32
    %7 = vector.broadcast %cst_6 : f32 to vector<16x128xf32>
    %8 = arith.maximumf %6, %7 : vector<16x128xf32>
    %9 = arith.truncf %8 : vector<16x128xf32> to vector<16x128xbf16>
    %c0_7 = arith.constant 0 : index
    %c0_8 = arith.constant 0 : index
    %c0_9 = arith.constant 0 : index
    %10 = vector.load %arg5[%c0_7, %c0_8, %c0_9] : memref<1x16x128xbf16, #tpu.memory_space<vmem>>, vector<1x16x128xbf16>
    %11 = vector.shape_cast %10 : vector<1x16x128xbf16> to vector<16x128xbf16>
    %12 = vector.shape_cast %9 : vector<16x128xbf16> to vector<1x16x128xbf16>
    tpu.vector_store %arg5[%c0_7, %c0_8, %c0_9], %12 {strides = array<i32>} : memref<1x16x128xbf16, #tpu.memory_space<vmem>>, vector<1x16x128xbf16>,
    return
  }
  func.func @transform_0(%arg0: i32, %arg1: i32) -> (i32, i32, i32) {
    %c0_i32 = arith.constant 0 : i32
    %c0_i32_0 = arith.constant 0 : i32
    return %arg0, %arg1, %c0_i32 : i32, i32, i32
  }
  func.func @transform_1(%arg0: i32, %arg1: i32) -> (i32, i32) {
    %c0_i32 = arith.constant 0 : i32
    %c0_i32_0 = arith.constant 0 : i32
    %c0_i32_1 = arith.constant 0 : i32
    return %c0_i32, %c0_i32_0 : i32, i32
  }
  func.func @transform_2(%arg0: i32, %arg1: i32) -> (i32, i32) {
    %c0_i32 = arith.constant 0 : i32
    %c0_i32_0 = arith.constant 0 : i32
    %c0_i32_1 = arith.constant 0 : i32
    return %c0_i32, %c0_i32_0 : i32, i32
  }
  func.func @transform_3(%arg0: i32, %arg1: i32) -> (i32, i32, i32) {
    %c0_i32 = arith.constant 0 : i32
    %c0_i32_0 = arith.constant 0 : i32
    return %arg0, %arg1, %c0_i32 : i32, i32, i32
  }
}

module attributes {stable_mosaic.version = 11 : i64} {
  func.func @_matmul_bias_relu_kernel(%arg0: i32, %arg1: i32, %arg2: memref<1x64x144xbf16, #tpu.memory_space<vmem>>, %arg3: memref<144x128xbf16, #tpu.memory_space<vmem>>, %arg4: memref<1x128xf32, #tpu.memory_space<vmem>>, %arg5: memref<1x64x128xbf16, #tpu.memory_space<vmem>>) attributes {dimension_semantics = [#tpu.dimension_semantics<parallel>, #tpu.dimension_semantics<parallel>], iteration_bounds = array<i64: 2, 1>, scalar_prefetch = 0 : i64, scratch_operands = 0 : i64, tpu.core_type = #tpu.core_type<tc>, window_params = [{transform_indices = @transform_0, window_bounds = array<i64: 1, 64, 144>}, {pipeline_mode = #tpu.pipeline_mode<synchronous>, transform_indices = @transform_1, window_bounds = array<i64: 144, 128>}, {pipeline_mode = #tpu.pipeline_mode<synchronous>, transform_indices = @transform_2, window_bounds = array<i64: 1, 128>}, {transform_indices = @transform_3, window_bounds = array<i64: 1, 64, 128>}]} {
    %c0 = arith.constant 0 : index
    %c0_0 = arith.constant 0 : index
    %c0_1 = arith.constant 0 : index
    %0 = vector.load %arg2[%c0, %c0_0, %c0_1] : memref<1x64x144xbf16, #tpu.memory_space<vmem>>, vector<1x64x144xbf16>
    %1 = vector.shape_cast %0 : vector<1x64x144xbf16> to vector<64x144xbf16>
    %c0_2 = arith.constant 0 : index
    %c0_3 = arith.constant 0 : index
    %2 = vector.load %arg3[%c0_2, %c0_3] : memref<144x128xbf16, #tpu.memory_space<vmem>>, vector<144x128xbf16>
    %cst = arith.constant dense<0.000000e+00> : vector<64x128xf32>
    %3 = tpu.matmul %1, %2, %cst {dimension_numbers = #tpu.dot_dimension_numbers<[1], [0], [0], [1], [0, 0, 1, 1], [], []>} : vector<64x144xbf16>, vector<144x128xbf16>, vector<64x128xf32> -> vector<64x128xf32>
    %c0_4 = arith.constant 0 : index
    %c0_5 = arith.constant 0 : index
    %4 = vector.load %arg4[%c0_4, %c0_5] : memref<1x128xf32, #tpu.memory_space<vmem>>, vector<1x128xf32>
    %5 = vector.broadcast %4 : vector<1x128xf32> to vector<64x128xf32>
    %6 = arith.addf %3, %5 : vector<64x128xf32>
    %cst_6 = arith.constant 0.000000e+00 : f32
    %7 = vector.broadcast %cst_6 : f32 to vector<64x128xf32>
    %8 = arith.maximumf %6, %7 : vector<64x128xf32>
    %9 = arith.truncf %8 : vector<64x128xf32> to vector<64x128xbf16>
    %c0_7 = arith.constant 0 : index
    %c0_8 = arith.constant 0 : index
    %c0_9 = arith.constant 0 : index
    %10 = vector.load %arg5[%c0_7, %c0_8, %c0_9] : memref<1x64x128xbf16, #tpu.memory_space<vmem>>, vector<1x64x128xbf16>
    %11 = vector.shape_cast %10 : vector<1x64x128xbf16> to vector<64x128xbf16>
    %12 = vector.shape_cast %9 : vector<64x128xbf16> to vector<1x64x128xbf16>
    tpu.vector_store %arg5[%c0_7, %c0_8, %c0_9], %12 {strides = array<i32>} : memref<1x64x128xbf16, #tpu.memory_space<vmem>>, vector<1x64x128xbf16>,
    return
  }
  func.func @transform_0(%arg0: i32, %arg1: i32) -> (i32, i32, i32) {
    %c0_i32 = arith.constant 0 : i32
    %c0_i32_0 = arith.constant 0 : i32
    return %arg0, %arg1, %c0_i32 : i32, i32, i32
  }
  func.func @transform_1(%arg0: i32, %arg1: i32) -> (i32, i32) {
    %c0_i32 = arith.constant 0 : i32
    %c0_i32_0 = arith.constant 0 : i32
    %c0_i32_1 = arith.constant 0 : i32
    return %c0_i32, %c0_i32_0 : i32, i32
  }
  func.func @transform_2(%arg0: i32, %arg1: i32) -> (i32, i32) {
    %c0_i32 = arith.constant 0 : i32
    %c0_i32_0 = arith.constant 0 : i32
    %c0_i32_1 = arith.constant 0 : i32
    return %c0_i32, %c0_i32_0 : i32, i32
  }
  func.func @transform_3(%arg0: i32, %arg1: i32) -> (i32, i32, i32) {
    %c0_i32 = arith.constant 0 : i32
    %c0_i32_0 = arith.constant 0 : i32
    return %arg0, %arg1, %c0_i32 : i32, i32, i32
  }
}

module attributes {stable_mosaic.version = 11 : i64} {
  func.func @_matmul_bias_relu_res_kernel(%arg0: i32, %arg1: i32, %arg2: memref<1x256x144xbf16, #tpu.memory_space<vmem>>, %arg3: memref<144x128xbf16, #tpu.memory_space<vmem>>, %arg4: memref<1x128xf32, #tpu.memory_space<vmem>>, %arg5: memref<1x256x128xbf16, #tpu.memory_space<vmem>>, %arg6: memref<1x256x128xbf16, #tpu.memory_space<vmem>>) attributes {dimension_semantics = [#tpu.dimension_semantics<parallel>, #tpu.dimension_semantics<parallel>], iteration_bounds = array<i64: 2, 1>, scalar_prefetch = 0 : i64, scratch_operands = 0 : i64, tpu.core_type = #tpu.core_type<tc>, window_params = [{transform_indices = @transform_0, window_bounds = array<i64: 1, 256, 144>}, {pipeline_mode = #tpu.pipeline_mode<synchronous>, transform_indices = @transform_1, window_bounds = array<i64: 144, 128>}, {pipeline_mode = #tpu.pipeline_mode<synchronous>, transform_indices = @transform_2, window_bounds = array<i64: 1, 128>}, {transform_indices = @transform_3, window_bounds = array<i64: 1, 256, 128>}, {transform_indices = @transform_4, window_bounds = array<i64: 1, 256, 128>}]} {
    %c0 = arith.constant 0 : index
    %c0_0 = arith.constant 0 : index
    %c0_1 = arith.constant 0 : index
    %0 = vector.load %arg2[%c0, %c0_0, %c0_1] : memref<1x256x144xbf16, #tpu.memory_space<vmem>>, vector<1x256x144xbf16>
    %1 = vector.shape_cast %0 : vector<1x256x144xbf16> to vector<256x144xbf16>
    %c0_2 = arith.constant 0 : index
    %c0_3 = arith.constant 0 : index
    %2 = vector.load %arg3[%c0_2, %c0_3] : memref<144x128xbf16, #tpu.memory_space<vmem>>, vector<144x128xbf16>
    %cst = arith.constant dense<0.000000e+00> : vector<256x128xf32>
    %3 = tpu.matmul %1, %2, %cst {dimension_numbers = #tpu.dot_dimension_numbers<[1], [0], [0], [1], [0, 0, 1, 1], [], []>} : vector<256x144xbf16>, vector<144x128xbf16>, vector<256x128xf32> -> vector<256x128xf32>
    %c0_4 = arith.constant 0 : index
    %c0_5 = arith.constant 0 : index
    %4 = vector.load %arg4[%c0_4, %c0_5] : memref<1x128xf32, #tpu.memory_space<vmem>>, vector<1x128xf32>
    %5 = vector.broadcast %4 : vector<1x128xf32> to vector<256x128xf32>
    %6 = arith.addf %3, %5 : vector<256x128xf32>
    %cst_6 = arith.constant 0.000000e+00 : f32
    %7 = vector.broadcast %cst_6 : f32 to vector<256x128xf32>
    %8 = arith.maximumf %6, %7 : vector<256x128xf32>
    %c0_7 = arith.constant 0 : index
    %c0_8 = arith.constant 0 : index
    %c0_9 = arith.constant 0 : index
    %9 = vector.load %arg5[%c0_7, %c0_8, %c0_9] : memref<1x256x128xbf16, #tpu.memory_space<vmem>>, vector<1x256x128xbf16>
    %10 = vector.shape_cast %9 : vector<1x256x128xbf16> to vector<256x128xbf16>
    %11 = arith.extf %10 : vector<256x128xbf16> to vector<256x128xf32>
    %12 = arith.addf %8, %11 : vector<256x128xf32>
    %13 = arith.truncf %12 : vector<256x128xf32> to vector<256x128xbf16>
    %c0_10 = arith.constant 0 : index
    %c0_11 = arith.constant 0 : index
    %c0_12 = arith.constant 0 : index
    %14 = vector.load %arg6[%c0_10, %c0_11, %c0_12] : memref<1x256x128xbf16, #tpu.memory_space<vmem>>, vector<1x256x128xbf16>
    %15 = vector.shape_cast %14 : vector<1x256x128xbf16> to vector<256x128xbf16>
    %16 = vector.shape_cast %13 : vector<256x128xbf16> to vector<1x256x128xbf16>
    tpu.vector_store %arg6[%c0_10, %c0_11, %c0_12], %16 {strides = array<i32>} : memref<1x256x128xbf16, #tpu.memory_space<vmem>>, vector<1x256x128xbf16>,
    return
  }
  func.func @transform_0(%arg0: i32, %arg1: i32) -> (i32, i32, i32) {
    %c0_i32 = arith.constant 0 : i32
    %c0_i32_0 = arith.constant 0 : i32
    return %arg0, %arg1, %c0_i32 : i32, i32, i32
  }
  func.func @transform_1(%arg0: i32, %arg1: i32) -> (i32, i32) {
    %c0_i32 = arith.constant 0 : i32
    %c0_i32_0 = arith.constant 0 : i32
    %c0_i32_1 = arith.constant 0 : i32
    return %c0_i32, %c0_i32_0 : i32, i32
  }
  func.func @transform_2(%arg0: i32, %arg1: i32) -> (i32, i32) {
    %c0_i32 = arith.constant 0 : i32
    %c0_i32_0 = arith.constant 0 : i32
    %c0_i32_1 = arith.constant 0 : i32
    return %c0_i32, %c0_i32_0 : i32, i32
  }
  func.func @transform_3(%arg0: i32, %arg1: i32) -> (i32, i32, i32) {
    %c0_i32 = arith.constant 0 : i32
    %c0_i32_0 = arith.constant 0 : i32
    return %arg0, %arg1, %c0_i32 : i32, i32, i32
  }
  func.func @transform_4(%arg0: i32, %arg1: i32) -> (i32, i32, i32) {
    %c0_i32 = arith.constant 0 : i32
    %c0_i32_0 = arith.constant 0 : i32
    return %arg0, %arg1, %c0_i32 : i32, i32, i32
  }
}

</mosaic_0001>

<bundles_post_ra>
// kernel: rsu_forward.8
= control target key start
LH: loop header
LB: loop body
LE: loop exit
PB: predicated region body
PF: predicated region fallthrough
CT: control target
= control target key end

     0   :  { %s964_s12 = smov 0   ;;  %s966_s13 = smov 0   ;;  %s1102_s0 = inlined_call_operand.vmem [shape: bf16[2,256,36], index: 0, kind: input, shape index: {}]   ;;  %s1103_s1 = inlined_call_operand.vmem [shape: bf16[36,128], index: 1, kind: input, shape index: {}]   ;;  %s1104_s2 = inlined_call_operand.vmem [shape: f32[1,128], index: 2, kind: input, shape index: {}]   ;;  %s1105_s3 = inlined_call_operand.vmem [shape: bf16[2,256,128], index: 3, kind: output, shape index: {}]  }
   0x1   :  { %s968_s14 = smov 0  }
   0x2 LB: > { %s25_s15 = sadd.s32 1, %s938_s13  ;;  %p676_p0 = scmp.ge.s32.totalorder %s942_s14, 1  ;;  %s942_s14 = sphi %s968_s14, %s13_s14   ;;  %s938_s13 = sphi %s966_s13, %s1107_s13   ;;  %s934_s12 = sphi %s964_s12, %s1106_s12  }
   0x3   : > { %p27_p1 = scmp.ge.s32.totalorder %s25_s15, 2  ;;  %p158_p2 = scmp.lt.s32.totalorder %s942_s14, 3 }
   0x5   : > { %s1109_s15 = smov (%p27_p1, %s25_s15), 0  ;;  %p159_p3 = pnand %p676_p0, %p158_p2 }
   0x6   : > { %p191_p4 = scmp.lt.s32.totalorder (!%p159_p3), %s934_s12, 1 }
   0x7   : > { %162 = sbr.rel (%p159_p3) target bundleno = 226 (0xe2), region = 32 }
   0xc   : > { %v247_v0 = vld [vmem:[%s1103_s1 + $0x10] sm:$0x3]  ;;  %vm396_vm0 = vcmask 1041408   ;;  %s1111_s12 = smov (!%p191_p4, %s934_s12), 1  ;;  %v790_v4 = vld [vmem:[%s1103_s1 + $0x8] sm:$0xff]  ;;  %v789_v5 = vld [vmem:[%s1103_s1] sm:$0xff] }
   0xd   : > { %v341_v1 = vunpack.c.l.b16 %v247_v0  ;;  %s771_s20 = sshll.u32 %s1111_s12, 7  ;;  %vm347_vm1 = vcmask 293888   ;;  %v1036_v24 = vld [vmem:[%s1104_s2] ss:$0 sm:$0xff] }
   0xe   : > { %s999_s25 = scalar_lea.vmem %s1102_s0, %s771_s20  ;;  %s1047_s30 = scalar_lea.vmem %s1105_s3, %s771_s20 }
   0xf   : > { %v344_v2 = vpack.c.b16 %v341_v1, %v341_v1  ;;  %v773_v6 = vld [vmem:[%s999_s25] sm:$0xff]  ;;  %v774_v10 = vld [vmem:[%s999_s25 + $0x8] sm:$0xff]  ;;  %v775_v14 = vld [vmem:[%s999_s25 + $0x10] sm:$0xff] }
  0x10   : > { %v777_v7 = vld [vmem:[%s999_s25 + $0x20] sm:$0xff]  ;;  %v778_v11 = vld [vmem:[%s999_s25 + $0x28] sm:$0xff]  ;;  %v779_v15 = vld [vmem:[%s999_s25 + $0x30] sm:$0xff] }
  0x11   : > { %v398_v3 = vsel %vm396_vm0, %v344_v2, 0  ;;  %v781_v8 = vld [vmem:[%s999_s25 + $0x40] sm:$0xff]  ;;  %v782_v12 = vld [vmem:[%s999_s25 + $0x48] sm:$0xff]  ;;  %v783_v16 = vld [vmem:[%s999_s25 + $0x50] sm:$0xff] }
  0x12   : > { %405 = vmatpush.bf16.msra.mxu0 %v398_v3  ;;  %886 = vmatpush.bf16.msra.mxu1 %v398_v3  ;;  %v785_v9 = vld [vmem:[%s999_s25 + $0x60] sm:$0xff]  ;;  %v786_v13 = vld [vmem:[%s999_s25 + $0x68] sm:$0xff]  ;;  %v787_v17 = vld [vmem:[%s999_s25 + $0x70] sm:$0xff] }
  0x13   : > { %887 = vmatpush.bf16.msra.mxu2 %v398_v3  ;;  %888 = vmatpush.bf16.msra.mxu3 %v398_v3  ;;  %v776_v18 = vld [vmem:[%s999_s25 + $0x18] sm:$0xff] }
  0x14   : > { %v780_v19 = vld [vmem:[%s999_s25 + $0x38] sm:$0xff] }
  0x15   : > { %v784_v20 = vld [vmem:[%s999_s25 + $0x58] sm:$0xff] }
  0x16   : > { %406 = vmatpush.bf16.msra.mxu0 %v790_v4  ;;  %889 = vmatpush.bf16.msra.mxu1 %v790_v4  ;;  %v788_v21 = vld [vmem:[%s999_s25 + $0x78] sm:$0xff] }
  0x17   : > { %890 = vmatpush.bf16.msra.mxu2 %v790_v4  ;;  %891 = vmatpush.bf16.msra.mxu3 %v790_v4 }
  0x1a   : > { %407 = vmatpush.bf16.msra.mxu0 %v789_v5  ;;  %892 = vmatpush.bf16.msra.mxu1 %v789_v5 }
  0x1b   : > { %893 = vmatpush.bf16.msra.mxu2 %v789_v5  ;;  %894 = vmatpush.bf16.msra.mxu3 %v789_v5 }
  0x1d   : > { %753 = vmatmul.msk.bf16.vlgmr.msra.gmra.mxu0 %vm347_vm1, %v773_v6  ;;  %757 = vmatmul.msk.bf16.vlgmr.msra.gmra.mxu1 %vm347_vm1, %v777_v7 }
  0x1e   : > { %761 = vmatmul.msk.bf16.vlgmr.msra.gmra.mxu2 %vm347_vm1, %v781_v8  ;;  %765 = vmatmul.msk.bf16.vlgmr.msra.gmra.mxu3 %vm347_vm1, %v785_v9 }
  0x2d   : > { %754 = vmatmul.msk.bf16.gmra.mxu0 %vm347_vm1, %v774_v10  ;;  %758 = vmatmul.msk.bf16.gmra.mxu1 %vm347_vm1, %v778_v11 }
  0x2e   : > { %762 = vmatmul.msk.bf16.gmra.mxu2 %vm347_vm1, %v782_v12  ;;  %766 = vmatmul.msk.bf16.gmra.mxu3 %vm347_vm1, %v786_v13 }
  0x3d   : > { %755 = vmatmul.msk.bf16.gmra.mxu0 %vm347_vm1, %v775_v14  ;;  %759 = vmatmul.msk.bf16.gmra.mxu1 %vm347_vm1, %v779_v15 }
  0x3e   : > { %763 = vmatmul.msk.bf16.gmra.mxu2 %vm347_vm1, %v783_v16  ;;  %767 = vmatmul.msk.bf16.gmra.mxu3 %vm347_vm1, %v787_v17 }
  0x4d   : > { %756 = vmatmul.msk.bf16.gmra.mxu0 %vm347_vm1, %v776_v18  ;;  %760 = vmatmul.msk.bf16.gmra.mxu1 %vm347_vm1, %v780_v19 }
  0x4e   : > { %764 = vmatmul.msk.bf16.gmra.mxu2 %vm347_vm1, %v784_v20  ;;  %768 = vmatmul.msk.bf16.gmra.mxu3 %vm347_vm1, %v788_v21 }
  0x9a   : > { %v409_v22 = vpop.f32.mrf.mxu0  ;;  %v429_v23 = vpop.f32.mrf.mxu1 }
  0x9b   : > { %v410_v25 = vadd.f32 %v1036_v24, %v409_v22  ;;  %v430_v26 = vadd.f32 %v1036_v24, %v429_v23 }
  0x9d   : > { %v489_v33 = vmax.f32 %v410_v25, 0.0  ;;  %v497_v34 = vmax.f32 %v430_v26, 0.0 }
  0xa1   : > { %v449_v27 = vpop.f32.mrf.mxu2  ;;  %v469_v28 = vpop.f32.mrf.mxu3 }
  0xa2   : > { %v411_v29 = vpop.f32.mrf.mxu0  ;;  %v431_v30 = vpop.f32.mrf.mxu1  ;;  %v450_v39 = vadd.f32 %v1036_v24, %v449_v27  ;;  %v470_v40 = vadd.f32 %v1036_v24, %v469_v28 }
  0xa3   : > { %v412_v31 = vadd.f32 %v1036_v24, %v411_v29  ;;  %v432_v32 = vadd.f32 %v1036_v24, %v431_v30 }
  0xa4   : > { %v505_v47 = vmax.f32 %v450_v39, 0.0  ;;  %v513_v48 = vmax.f32 %v470_v40, 0.0 }
  0xa5   : > { %v490_v35 = vmax.f32 %v412_v31, 0.0  ;;  %v498_v36 = vmax.f32 %v432_v32, 0.0 }
  0xa7   : > { %v794_v37 = vpack.c.bf16 %v490_v35, %v489_v33  ;;  %v814_v38 = vpack.c.bf16 %v498_v36, %v497_v34 }
  0xa9   : > { %795 = vst [vmem:[%s1047_s30] sm:$0xff] %v794_v37   ;;  %v451_v41 = vpop.f32.mrf.mxu2  ;;  %v471_v42 = vpop.f32.mrf.mxu3 }
  0xaa   : > { %874 = vst [vmem:[%s1047_s30 + $0x20] sm:$0xff] %v814_v38   ;;  %v452_v43 = vadd.f32 %v1036_v24, %v451_v41  ;;  %v472_v44 = vadd.f32 %v1036_v24, %v471_v42  ;;  %v414_v45 = vpop.f32.mrf.mxu0  ;;  %v434_v46 = vpop.f32.mrf.mxu1 }
  0xab   : > { %v415_v53 = vadd.f32 %v1036_v24, %v414_v45  ;;  %v435_v54 = vadd.f32 %v1036_v24, %v434_v46 }
  0xac   : > { %v506_v49 = vmax.f32 %v452_v43, 0.0  ;;  %v514_v50 = vmax.f32 %v472_v44, 0.0 }
  0xad   : > { %v491_v61 = vmax.f32 %v415_v53, 0.0  ;;  %v499_v62 = vmax.f32 %v435_v54, 0.0 }
  0xae   : > { %v834_v51 = vpack.c.bf16 %v506_v49, %v505_v47  ;;  %v854_v52 = vpack.c.bf16 %v514_v50, %v513_v48 }
  0xb0   : > { %878 = vst [vmem:[%s1047_s30 + $0x40] sm:$0xff] %v834_v51  }
  0xb1   : > { %882 = vst [vmem:[%s1047_s30 + $0x60] sm:$0xff] %v854_v52   ;;  %v454_v55 = vpop.f32.mrf.mxu2  ;;  %v474_v56 = vpop.f32.mrf.mxu3 }
  0xb2   : > { %v416_v57 = vpop.f32.mrf.mxu0  ;;  %v436_v58 = vpop.f32.mrf.mxu1  ;;  %v455_v3 = vadd.f32 %v1036_v24, %v454_v55  ;;  %v475_v4 = vadd.f32 %v1036_v24, %v474_v56 }
  0xb3   : > { %v417_v59 = vadd.f32 %v1036_v24, %v416_v57  ;;  %v437_v60 = vadd.f32 %v1036_v24, %v436_v58 }
  0xb4   : > { %v507_v11 = vmax.f32 %v455_v3, 0.0  ;;  %v515_v12 = vmax.f32 %v475_v4, 0.0 }
  0xb5   : > { %v492_v63 = vmax.f32 %v417_v59, 0.0  ;;  %v500_v0 = vmax.f32 %v437_v60, 0.0 }
  0xb7   : > { %v799_v1 = vpack.c.bf16 %v492_v63, %v491_v61  ;;  %v819_v2 = vpack.c.bf16 %v500_v0, %v499_v62 }
  0xb9   : > { %871 = vst [vmem:[%s1047_s30 + $0x8] sm:$0xff] %v799_v1   ;;  %v456_v5 = vpop.f32.mrf.mxu2  ;;  %v476_v6 = vpop.f32.mrf.mxu3 }
  0xba   : > { %875 = vst [vmem:[%s1047_s30 + $0x28] sm:$0xff] %v819_v2   ;;  %v457_v7 = vadd.f32 %v1036_v24, %v456_v5  ;;  %v477_v8 = vadd.f32 %v1036_v24, %v476_v6  ;;  %v419_v9 = vpop.f32.mrf.mxu0  ;;  %v439_v10 = vpop.f32.mrf.mxu1 }
  0xbb   : > { %v420_v17 = vadd.f32 %v1036_v24, %v419_v9  ;;  %v440_v18 = vadd.f32 %v1036_v24, %v439_v10 }
  0xbc   : > { %v508_v13 = vmax.f32 %v457_v7, 0.0  ;;  %v516_v14 = vmax.f32 %v477_v8, 0.0 }
  0xbd   : > { %v493_v26 = vmax.f32 %v420_v17, 0.0  ;;  %v501_v27 = vmax.f32 %v440_v18, 0.0 }
  0xbe   : > { %v839_v15 = vpack.c.bf16 %v508_v13, %v507_v11  ;;  %v859_v16 = vpack.c.bf16 %v516_v14, %v515_v12 }
  0xc0   : > { %879 = vst [vmem:[%s1047_s30 + $0x48] sm:$0xff] %v839_v15  }
  0xc1   : > { %883 = vst [vmem:[%s1047_s30 + $0x68] sm:$0xff] %v859_v16   ;;  %v459_v19 = vpop.f32.mrf.mxu2  ;;  %v479_v20 = vpop.f32.mrf.mxu3 }
  0xc2   : > { %v421_v21 = vpop.f32.mrf.mxu0  ;;  %v441_v22 = vpop.f32.mrf.mxu1  ;;  %v460_v32 = vadd.f32 %v1036_v24, %v459_v19  ;;  %v480_v33 = vadd.f32 %v1036_v24, %v479_v20 }
  0xc3   : > { %v422_v23 = vadd.f32 %v1036_v24, %v421_v21  ;;  %v442_v25 = vadd.f32 %v1036_v24, %v441_v22 }
  0xc4   : > { %v509_v40 = vmax.f32 %v460_v32, 0.0  ;;  %v517_v41 = vmax.f32 %v480_v33, 0.0 }
  0xc5   : > { %v494_v28 = vmax.f32 %v422_v23, 0.0  ;;  %v502_v29 = vmax.f32 %v442_v25, 0.0 }
  0xc7   : > { %v804_v30 = vpack.c.bf16 %v494_v28, %v493_v26  ;;  %v824_v31 = vpack.c.bf16 %v502_v29, %v501_v27 }
  0xc9   : > { %872 = vst [vmem:[%s1047_s30 + $0x10] sm:$0xff] %v804_v30   ;;  %v461_v34 = vpop.f32.mrf.mxu2  ;;  %v481_v35 = vpop.f32.mrf.mxu3 }
  0xca   : > { %876 = vst [vmem:[%s1047_s30 + $0x30] sm:$0xff] %v824_v31   ;;  %v462_v36 = vadd.f32 %v1036_v24, %v461_v34  ;;  %v482_v37 = vadd.f32 %v1036_v24, %v481_v35  ;;  %v424_v38 = vpop.f32.mrf.mxu0  ;;  %v444_v39 = vpop.f32.mrf.mxu1 }
  0xcb   : > { %v425_v46 = vadd.f32 %v1036_v24, %v424_v38  ;;  %v445_v47 = vadd.f32 %v1036_v24, %v444_v39 }
  0xcc   : > { %v510_v42 = vmax.f32 %v462_v36, 0.0  ;;  %v518_v43 = vmax.f32 %v482_v37, 0.0 }
  0xcd   : > { %v495_v54 = vmax.f32 %v425_v46, 0.0  ;;  %v503_v55 = vmax.f32 %v445_v47, 0.0 }
  0xce   : > { %v844_v44 = vpack.c.bf16 %v510_v42, %v509_v40  ;;  %v864_v45 = vpack.c.bf16 %v518_v43, %v517_v41 }
  0xd0   : > { %880 = vst [vmem:[%s1047_s30 + $0x50] sm:$0xff] %v844_v44  }
  0xd1   : > { %884 = vst [vmem:[%s1047_s30 + $0x70] sm:$0xff] %v864_v45   ;;  %v464_v48 = vpop.f32.mrf.mxu2  ;;  %v484_v49 = vpop.f32.mrf.mxu3 }
  0xd2   : > { %v426_v50 = vpop.f32.mrf.mxu0  ;;  %v446_v51 = vpop.f32.mrf.mxu1  ;;  %v465_v60 = vadd.f32 %v1036_v24, %v464_v48  ;;  %v485_v61 = vadd.f32 %v1036_v24, %v484_v49 }
  0xd3   : > { %v427_v52 = vadd.f32 %v1036_v24, %v426_v50  ;;  %v447_v53 = vadd.f32 %v1036_v24, %v446_v51 }
  0xd4   : > { %v511_v2 = vmax.f32 %v465_v60, 0.0  ;;  %v519_v3 = vmax.f32 %v485_v61, 0.0 }
  0xd5   : > { %v496_v56 = vmax.f32 %v427_v52, 0.0  ;;  %v504_v57 = vmax.f32 %v447_v53, 0.0 }
  0xd7   : > { %v809_v58 = vpack.c.bf16 %v496_v56, %v495_v54  ;;  %v829_v59 = vpack.c.bf16 %v504_v57, %v503_v55 }
  0xd9   : > { %873 = vst [vmem:[%s1047_s30 + $0x18] sm:$0xff] %v809_v58   ;;  %v466_v62 = vpop.f32.mrf.mxu2  ;;  %v486_v63 = vpop.f32.mrf.mxu3 }
  0xda   : > { %877 = vst [vmem:[%s1047_s30 + $0x38] sm:$0xff] %v829_v59   ;;  %v467_v0 = vadd.f32 %v1036_v24, %v466_v62  ;;  %v487_v1 = vadd.f32 %v1036_v24, %v486_v63 }
  0xdc   : > { %v512_v4 = vmax.f32 %v467_v0, 0.0  ;;  %v520_v5 = vmax.f32 %v487_v1, 0.0 }
  0xde   : > { %v849_v6 = vpack.c.bf16 %v512_v4, %v511_v2  ;;  %v869_v7 = vpack.c.bf16 %v520_v5, %v519_v3 }
  0xe0   : > { %881 = vst [vmem:[%s1047_s30 + $0x58] sm:$0xff] %v849_v6  }
  0xe1   : > { %885 = vst [vmem:[%s1047_s30 + $0x78] sm:$0xff] %v869_v7  }
  0xe2 PF: > { %s13_s14 = sadd.s32 1, %s942_s14   ;;  %s1106_s12 = smov %s938_s13 }
  0xe3   : > { %p10_p5 = scmp.ge.s32.totalorder %s13_s14, 4   ;;  %s1107_s13 = smov %s1109_s15 }
  0xe5   :  { %12 = sbr.rel (!%p10_p5) target bundleno = 2 (0x2), region = 62 }

// kernel: rsu_forward.10
= control target key start
LH: loop header
LB: loop body
LE: loop exit
PB: predicated region body
PF: predicated region fallthrough
CT: control target
= control target key end

     0   :  { %s600_s12 = smov 0   ;;  %s602_s13 = smov 0   ;;  %s658_s0 = inlined_call_operand.vmem [shape: bf16[2,64,72], index: 0, kind: input, shape index: {}]   ;;  %s659_s1 = inlined_call_operand.vmem [shape: bf16[72,128], index: 1, kind: input, shape index: {}]   ;;  %s660_s2 = inlined_call_operand.vmem [shape: f32[1,128], index: 2, kind: input, shape index: {}]   ;;  %s661_s3 = inlined_call_operand.vmem [shape: bf16[2,64,128], index: 3, kind: output, shape index: {}]  }
   0x1   :  { %s604_s14 = smov 0  }
   0x2 LB: > { %s25_s15 = sadd.s32 1, %s574_s13  ;;  %p440_p0 = scmp.ge.s32.totalorder %s578_s14, 1  ;;  %s578_s14 = sphi %s604_s14, %s13_s14   ;;  %s574_s13 = sphi %s602_s13, %s663_s13   ;;  %s570_s12 = sphi %s600_s12, %s662_s12  }
   0x3   : > { %p27_p1 = scmp.ge.s32.totalorder %s25_s15, 2  ;;  %p158_p2 = scmp.lt.s32.totalorder %s578_s14, 3 }
   0x5   : > { %s665_s15 = smov (%p27_p1, %s25_s15), 0  ;;  %p159_p3 = pnand %p440_p0, %p158_p2 }
   0x6   : > { %p191_p4 = scmp.lt.s32.totalorder (!%p159_p3), %s570_s12, 1 }
   0x7   : > { %162 = sbr.rel (%p159_p3) target bundleno = 186 (0xba), region = 32 }
   0xc   : > { %v227_v0 = vld [vmem:[%s659_s1 + $0x20] sm:$0xf]  ;;  %vm292_vm0 = vcmask 1043456   ;;  %v492_v4 = vld [vmem:[%s659_s1 + $0x18] sm:$0xff]  ;;  %v491_v5 = vld [vmem:[%s659_s1 + $0x10] sm:$0xff]  ;;  %s667_s12 = smov (!%p191_p4, %s570_s12), 1 }
   0xd   : > { %v269_v1 = vunpack.c.l.b16 %v227_v0  ;;  %v490_v6 = vld [vmem:[%s659_s1 + $0x8] sm:$0xff]  ;;  %s483_s24 = sshll.u32 %s667_s12, 5  ;;  %v489_v7 = vld [vmem:[%s659_s1] sm:$0xff]  ;;  %vm279_vm1 = vcmask 588800  }
   0xe   : > { %s198_s29 = scalar_lea.vmem %s658_s0, %s483_s24  ;;  %v555_v14 = vld [vmem:[%s660_s2] ss:$0 sm:$0xff]  ;;  %s208_s7 = scalar_lea.vmem %s661_s3, %s483_s24 }
   0xf   : > { %v274_v2 = vpack.c.b16 %v269_v1, %v269_v1  ;;  %v485_v8 = vld [vmem:[%s198_s29] sm:$0xff]  ;;  %v486_v9 = vld [vmem:[%s198_s29 + $0x8] sm:$0xff]  ;;  %v487_v10 = vld [vmem:[%s198_s29 + $0x10] sm:$0xff] }
  0x10   : > { %v488_v11 = vld [vmem:[%s198_s29 + $0x18] sm:$0xff] }
  0x11   : > { %v294_v3 = vsel %vm292_vm0, %v274_v2, 0 }
  0x12   : > { %299 = vmatpush.bf16.msra.mxu0 %v294_v3  ;;  %516 = vmatpush.bf16.msra.mxu1 %v294_v3 }
  0x13   : > { %517 = vmatpush.bf16.msra.mxu2 %v294_v3  ;;  %518 = vmatpush.bf16.msra.mxu3 %v294_v3 }
  0x16   : > { %300 = vmatpush.bf16.msra.mxu0 %v492_v4  ;;  %519 = vmatpush.bf16.msra.mxu1 %v492_v4 }
  0x17   : > { %520 = vmatpush.bf16.msra.mxu2 %v492_v4  ;;  %521 = vmatpush.bf16.msra.mxu3 %v492_v4 }
  0x1a   : > { %301 = vmatpush.bf16.msra.mxu0 %v491_v5  ;;  %522 = vmatpush.bf16.msra.mxu1 %v491_v5 }
  0x1b   : > { %523 = vmatpush.bf16.msra.mxu2 %v491_v5  ;;  %524 = vmatpush.bf16.msra.mxu3 %v491_v5 }
  0x1e   : > { %302 = vmatpush.bf16.msra.mxu0 %v490_v6  ;;  %525 = vmatpush.bf16.msra.mxu1 %v490_v6 }
  0x1f   : > { %526 = vmatpush.bf16.msra.mxu2 %v490_v6  ;;  %527 = vmatpush.bf16.msra.mxu3 %v490_v6 }
  0x22   : > { %303 = vmatpush.bf16.msra.mxu0 %v489_v7  ;;  %528 = vmatpush.bf16.msra.mxu1 %v489_v7 }
  0x23   : > { %529 = vmatpush.bf16.msra.mxu2 %v489_v7  ;;  %530 = vmatpush.bf16.msra.mxu3 %v489_v7 }
  0x25   : > { %477 = vmatmul.msk.bf16.vlgmr.msra.gmra.mxu0 %vm279_vm1, %v485_v8  ;;  %478 = vmatmul.msk.bf16.vlgmr.msra.gmra.mxu1 %vm279_vm1, %v486_v9 }
  0x26   : > { %479 = vmatmul.msk.bf16.vlgmr.msra.gmra.mxu2 %vm279_vm1, %v487_v10  ;;  %480 = vmatmul.msk.bf16.vlgmr.msra.gmra.mxu3 %vm279_vm1, %v488_v11 }
  0xa2   : > { %v305_v12 = vpop.f32.mrf.mxu0  ;;  %v310_v13 = vpop.f32.mrf.mxu1 }
  0xa3   : > { %v306_v15 = vadd.f32 %v555_v14, %v305_v12  ;;  %v311_v16 = vadd.f32 %v555_v14, %v310_v13 }
  0xa5   : > { %v325_v23 = vmax.f32 %v306_v15, 0.0  ;;  %v327_v24 = vmax.f32 %v311_v16, 0.0 }
  0xa9   : > { %v315_v17 = vpop.f32.mrf.mxu2  ;;  %v320_v18 = vpop.f32.mrf.mxu3 }
  0xaa   : > { %v307_v19 = vpop.f32.mrf.mxu0  ;;  %v312_v20 = vpop.f32.mrf.mxu1  ;;  %v316_v29 = vadd.f32 %v555_v14, %v315_v17  ;;  %v321_v30 = vadd.f32 %v555_v14, %v320_v18 }
  0xab   : > { %v308_v21 = vadd.f32 %v555_v14, %v307_v19  ;;  %v313_v22 = vadd.f32 %v555_v14, %v312_v20 }
  0xac   : > { %v329_v35 = vmax.f32 %v316_v29, 0.0  ;;  %v331_v36 = vmax.f32 %v321_v30, 0.0 }
  0xad   : > { %v326_v25 = vmax.f32 %v308_v21, 0.0  ;;  %v328_v26 = vmax.f32 %v313_v22, 0.0 }
  0xaf   : > { %v496_v27 = vpack.c.bf16 %v326_v25, %v325_v23  ;;  %v501_v28 = vpack.c.bf16 %v328_v26, %v327_v24 }
  0xb1   : > { %497 = vst [vmem:[%s208_s7] sm:$0xff] %v496_v27   ;;  %v317_v31 = vpop.f32.mrf.mxu2  ;;  %v322_v32 = vpop.f32.mrf.mxu3 }
  0xb2   : > { %513 = vst [vmem:[%s208_s7 + $0x8] sm:$0xff] %v501_v28   ;;  %v318_v33 = vadd.f32 %v555_v14, %v317_v31  ;;  %v323_v34 = vadd.f32 %v555_v14, %v322_v32 }
  0xb4   : > { %v330_v37 = vmax.f32 %v318_v33, 0.0  ;;  %v332_v38 = vmax.f32 %v323_v34, 0.0 }
  0xb6   : > { %v506_v39 = vpack.c.bf16 %v330_v37, %v329_v35  ;;  %v511_v40 = vpack.c.bf16 %v332_v38, %v331_v36 }
  0xb8   : > { %514 = vst [vmem:[%s208_s7 + $0x10] sm:$0xff] %v506_v39  }
  0xb9   : > { %515 = vst [vmem:[%s208_s7 + $0x18] sm:$0xff] %v511_v40  }
  0xba PF: > { %s13_s14 = sadd.s32 1, %s578_s14   ;;  %s662_s12 = smov %s574_s13 }
  0xbb   : > { %p10_p5 = scmp.ge.s32.totalorder %s13_s14, 4   ;;  %s663_s13 = smov %s665_s15 }
  0xbd   :  { %12 = sbr.rel (!%p10_p5) target bundleno = 2 (0x2), region = 62 }

// kernel: rsu_forward.11
= control target key start
LH: loop header
LB: loop body
LE: loop exit
PB: predicated region body
PF: predicated region fallthrough
CT: control target
= control target key end

     0   :  { %s486_s12 = smov 0   ;;  %s488_s13 = smov 0   ;;  %s537_s0 = inlined_call_operand.vmem [shape: bf16[2,16,72], index: 0, kind: input, shape index: {}]   ;;  %s538_s1 = inlined_call_operand.vmem [shape: bf16[72,128], index: 1, kind: input, shape index: {}]   ;;  %s539_s2 = inlined_call_operand.vmem [shape: f32[1,128], index: 2, kind: input, shape index: {}]   ;;  %s540_s3 = inlined_call_operand.vmem [shape: bf16[2,16,128], index: 3, kind: output, shape index: {}]  }
   0x1   :  { %s490_s14 = smov 0  }
   0x2 LB: > { %s25_s15 = sadd.s32 1, %s460_s13  ;;  %p377_p0 = scmp.ge.s32.totalorder %s464_s14, 1  ;;  %s464_s14 = sphi %s490_s14, %s13_s14   ;;  %s460_s13 = sphi %s488_s13, %s542_s13   ;;  %s456_s12 = sphi %s486_s12, %s541_s12  }
   0x3   : > { %p27_p1 = scmp.ge.s32.totalorder %s25_s15, 2  ;;  %p158_p2 = scmp.lt.s32.totalorder %s464_s14, 3 }
   0x5   : > { %s544_s15 = smov (%p27_p1, %s25_s15), 0  ;;  %p159_p3 = pnand %p377_p0, %p158_p2 }
   0x6   : > { %p191_p4 = scmp.lt.s32.totalorder (!%p159_p3), %s456_s12, 1 }
   0x7   : > { %162 = sbr.rel (%p159_p3) target bundleno = 178 (0xb2), region = 32 }
   0xc   : > { %v221_v0 = vld [vmem:[%s538_s1 + $0x20] sm:$0xf]  ;;  %vm262_vm0 = vcmask 1043456   ;;  %v411_v4 = vld [vmem:[%s538_s1 + $0x18] sm:$0xff]  ;;  %v410_v5 = vld [vmem:[%s538_s1 + $0x10] sm:$0xff]  ;;  %s546_s12 = smov (!%p191_p4, %s456_s12), 1 }
   0xd   : > { %v248_v1 = vunpack.c.l.b16 %v221_v0  ;;  %v409_v6 = vld [vmem:[%s538_s1 + $0x8] sm:$0xff]  ;;  %s405_s24 = sshll.u32 %s546_s12, 3  ;;  %v408_v7 = vld [vmem:[%s538_s1] sm:$0xff]  ;;  %vm258_vm1 = vcmask 588800  }
   0xe   : > { %s198_s29 = scalar_lea.vmem %s537_s0, %s405_s24  ;;  %v441_v10 = vld [vmem:[%s539_s2] ss:$0 sm:$0xff]  ;;  %s208_s7 = scalar_lea.vmem %s540_s3, %s405_s24 }
   0xf   : > { %v253_v2 = vpack.c.b16 %v248_v1, %v248_v1  ;;  %v407_v8 = vld [vmem:[%s198_s29] sm:$0xff] }
  0x11   : > { %v264_v3 = vsel %vm262_vm0, %v253_v2, 0 }
  0x12   : > { %269 = vmatpush.bf16.msra.mxu0 %v264_v3 }
  0x16   : > { %270 = vmatpush.bf16.msra.mxu0 %v411_v4 }
  0x1a   : > { %271 = vmatpush.bf16.msra.mxu0 %v410_v5 }
  0x1e   : > { %272 = vmatpush.bf16.msra.mxu0 %v409_v6 }
  0x22   : > { %273 = vmatpush.bf16.msra.mxu0 %v408_v7 }
  0x25   : > { %402 = vmatmul.msk.bf16.vlgmr.msra.gmra.mxu0 %vm258_vm1, %v407_v8 }
  0xa2   : > { %v275_v9 = vpop.f32.mrf.mxu0 }
  0xa3   : > { %v276_v11 = vadd.f32 %v441_v10, %v275_v9 }
  0xa5   : > { %v280_v14 = vmax.f32 %v276_v11, 0.0 }
  0xaa   : > { %v277_v12 = vpop.f32.mrf.mxu0 }
  0xab   : > { %v278_v13 = vadd.f32 %v441_v10, %v277_v12 }
  0xad   : > { %v281_v15 = vmax.f32 %v278_v13, 0.0 }
  0xaf   : > { %v415_v16 = vpack.c.bf16 %v281_v15, %v280_v14 }
  0xb1   : > { %416 = vst [vmem:[%s208_s7] sm:$0xff] %v415_v16  }
  0xb2 PF: > { %s13_s14 = sadd.s32 1, %s464_s14   ;;  %s541_s12 = smov %s460_s13 }
  0xb3   : > { %p10_p5 = scmp.ge.s32.totalorder %s13_s14, 4   ;;  %s542_s13 = smov %s544_s15 }
  0xb5   :  { %12 = sbr.rel (!%p10_p5) target bundleno = 2 (0x2), region = 62 }

// kernel: rsu_forward.13
= control target key start
LH: loop header
LB: loop body
LE: loop exit
PB: predicated region body
PF: predicated region fallthrough
CT: control target
= control target key end

     0   :  { %s572_s12 = smov 0   ;;  %s574_s13 = smov 0   ;;  %s639_s0 = inlined_call_operand.vmem [shape: bf16[2,16,144], index: 0, kind: input, shape index: {}]   ;;  %s640_s1 = inlined_call_operand.vmem [shape: bf16[144,128], index: 1, kind: input, shape index: {}]   ;;  %s641_s2 = inlined_call_operand.vmem [shape: f32[1,128], index: 2, kind: input, shape index: {}]   ;;  %s642_s3 = inlined_call_operand.vmem [shape: bf16[2,16,128], index: 3, kind: output, shape index: {}]  }
   0x1   :  { %s576_s14 = smov 0  }
   0x2 LB: > { %s25_s15 = sadd.s32 1, %s546_s13  ;;  %p433_p0 = scmp.ge.s32.totalorder %s550_s14, 1  ;;  %s550_s14 = sphi %s576_s14, %s13_s14   ;;  %s546_s13 = sphi %s574_s13, %s644_s13   ;;  %s542_s12 = sphi %s572_s12, %s643_s12  }
   0x3   : > { %p27_p1 = scmp.ge.s32.totalorder %s25_s15, 2  ;;  %p159_p2 = scmp.lt.s32.totalorder %s550_s14, 3 }
   0x5   : > { %s646_s15 = smov (%p27_p1, %s25_s15), 0  ;;  %p160_p3 = pnand %p433_p0, %p159_p2 }
   0x6   : > { %p193_p4 = scmp.lt.s32.totalorder (!%p160_p3), %s542_s12, 1 }
   0x7   : > { %163 = sbr.rel (%p160_p3) target bundleno = 187 (0xbb), region = 32 }
   0xc   : > { %v496_v0 = vld [vmem:[%s640_s1 + $0x38] sm:$0xff]  ;;  %v495_v1 = vld [vmem:[%s640_s1 + $0x30] sm:$0xff]  ;;  %v497_v2 = vld [vmem:[%s640_s1 + $0x40] sm:$0xff]  ;;  %s648_s12 = smov (!%p193_p4, %s542_s12), 1  ;;  %vm301_vm0 = vcmask 130048  }
   0xd   : > { %305 = vmatpush.bf16.msra.mxu0 %v496_v0  ;;  %326 = vmatpush.bf16.msra.mxu1 %v497_v2  ;;  %s485_s22 = sshll.u32 %s648_s12, 4  ;;  %v494_v3 = vld [vmem:[%s640_s1 + $0x28] sm:$0xff]  ;;  %v493_v7 = vld [vmem:[%s640_s1 + $0x20] sm:$0xff]  ;;  %v492_v8 = vld [vmem:[%s640_s1 + $0x18] sm:$0xff]  ;;  %s486_s17 = sshll.u32 %s648_s12, 3 }
   0xe   : > { %s201_s25 = scalar_lea.vmem %s639_s0, %s485_s22  ;;  %v491_v9 = vld [vmem:[%s640_s1 + $0x10] sm:$0xff]  ;;  %v490_v10 = vld [vmem:[%s640_s1 + $0x8] sm:$0xff]  ;;  %v489_v11 = vld [vmem:[%s640_s1] sm:$0xff]  ;;  %s211_s20 = scalar_lea.vmem %s642_s3, %s486_s17 }
   0xf   : > { %v487_v4 = vld [vmem:[%s201_s25 + $0x4] sm:$0xf]  ;;  %v442_v5 = vld [vmem:[%s201_s25 + $0x8] sm:$0xf0]  ;;  %v440_v12 = vld [vmem:[%s201_s25] sm:$0xf] }
  0x10   : > { %v445_v6 = vor.u32 %v487_v4, %v442_v5  ;;  %v488_v13 = vld [vmem:[%s201_s25 + $0x4] sm:$0xf0]  ;;  %v527_v17 = vld [vmem:[%s641_s2] ss:$0 sm:$0xff] }
  0x11   : > { %306 = vmatpush.bf16.msra.mxu0 %v495_v1  ;;  %v441_v14 = vor.u32 %v488_v13, %v440_v12 }
  0x12   : > { %482 = vmatmul.msk.bf16.vlgmr.msra.gmra.mxu1 %vm301_vm0, %v445_v6 }
  0x15   : > { %307 = vmatpush.bf16.msra.mxu0 %v494_v3 }
  0x19   : > { %308 = vmatpush.bf16.msra.mxu0 %v493_v7 }
  0x1d   : > { %309 = vmatpush.bf16.msra.mxu0 %v492_v8 }
  0x21   : > { %310 = vmatpush.bf16.msra.mxu0 %v491_v9 }
  0x25   : > { %311 = vmatpush.bf16.msra.mxu0 %v490_v10 }
  0x29   : > { %312 = vmatpush.bf16.msra.mxu0 %v489_v11 }
  0x2c   : > { %313 = vmatmul.bf16.vlgmr.msra.gmra.mxu0 %v441_v14 }
  0x8f   : > { %v328_v15 = vpop.f32.mrf.mxu1 }
  0x97   : > { %v330_v22 = vpop.f32.mrf.mxu1 }
  0xa9   : > { %v314_v16 = vpop.f32.mrf.mxu0 }
  0xaa   : > { %v315_v18 = vadd.f32 %v527_v17, %v314_v16 }
  0xac   : > { %v329_v20 = vadd.f32 %v328_v15, %v315_v18 }
  0xae   : > { %v333_v24 = vmax.f32 %v329_v20, 0.0 }
  0xb1   : > { %v316_v19 = vpop.f32.mrf.mxu0 }
  0xb2   : > { %v317_v21 = vadd.f32 %v527_v17, %v316_v19 }
  0xb4   : > { %v331_v23 = vadd.f32 %v330_v22, %v317_v21 }
  0xb6   : > { %v334_v25 = vmax.f32 %v331_v23, 0.0 }
  0xb8   : > { %v501_v26 = vpack.c.bf16 %v334_v25, %v333_v24 }
  0xba   : > { %502 = vst [vmem:[%s211_s20] sm:$0xff] %v501_v26  }
  0xbb PF: > { %s13_s14 = sadd.s32 1, %s550_s14   ;;  %s643_s12 = smov %s546_s13 }
  0xbc   : > { %p10_p5 = scmp.ge.s32.totalorder %s13_s14, 4   ;;  %s644_s13 = smov %s646_s15 }
  0xbe   :  { %12 = sbr.rel (!%p10_p5) target bundleno = 2 (0x2), region = 62 }

// kernel: rsu_forward.14
= control target key start
LH: loop header
LB: loop body
LE: loop exit
PB: predicated region body
PF: predicated region fallthrough
CT: control target
= control target key end

     0   :  { %s722_s12 = smov 0   ;;  %s724_s13 = smov 0   ;;  %s817_s0 = inlined_call_operand.vmem [shape: bf16[2,64,144], index: 0, kind: input, shape index: {}]   ;;  %s818_s1 = inlined_call_operand.vmem [shape: bf16[144,128], index: 1, kind: input, shape index: {}]   ;;  %s819_s2 = inlined_call_operand.vmem [shape: f32[1,128], index: 2, kind: input, shape index: {}]   ;;  %s820_s3 = inlined_call_operand.vmem [shape: bf16[2,64,128], index: 3, kind: output, shape index: {}]  }
   0x1   :  { %s726_s14 = smov 0  }
   0x2 LB: > { %s25_s15 = sadd.s32 1, %s696_s13  ;;  %p523_p0 = scmp.ge.s32.totalorder %s700_s14, 1  ;;  %s700_s14 = sphi %s726_s14, %s13_s14   ;;  %s696_s13 = sphi %s724_s13, %s822_s13   ;;  %s692_s12 = sphi %s722_s12, %s821_s12  }
   0x3   : > { %p27_p1 = scmp.ge.s32.totalorder %s25_s15, 2  ;;  %p159_p2 = scmp.lt.s32.totalorder %s700_s14, 3 }
   0x5   : > { %s824_s15 = smov (%p27_p1, %s25_s15), 0  ;;  %p160_p3 = pnand %p523_p0, %p159_p2 }
   0x6   : > { %p193_p4 = scmp.lt.s32.totalorder (!%p160_p3), %s692_s12, 1 }
   0x7   : > { %163 = sbr.rel (%p160_p3) target bundleno = 209 (0xd1), region = 32 }
   0xc   : > { %v619_v0 = vld [vmem:[%s818_s1 + $0x38] sm:$0xff]  ;;  %v620_v1 = vld [vmem:[%s818_s1 + $0x40] sm:$0xff]  ;;  %v618_v2 = vld [vmem:[%s818_s1 + $0x30] sm:$0xff]  ;;  %s826_s12 = smov (!%p193_p4, %s692_s12), 1  ;;  %vm334_vm0 = vcmask 130048  }
   0xd   : > { %347 = vmatpush.bf16.msra.mxu0 %v619_v0  ;;  %644 = vmatpush.bf16.msra.mxu2 %v619_v0  ;;  %s602_s22 = sshll.u32 %s826_s12, 6  ;;  %v617_v3 = vld [vmem:[%s818_s1 + $0x28] sm:$0xff]  ;;  %v616_v9 = vld [vmem:[%s818_s1 + $0x20] sm:$0xff]  ;;  %v615_v11 = vld [vmem:[%s818_s1 + $0x18] sm:$0xff]  ;;  %s603_s17 = sshll.u32 %s826_s12, 5 }
   0xe   : > { %652 = vmatpush.bf16.msra.mxu3 %v620_v1  ;;  %383 = vmatpush.bf16.msra.mxu1 %v620_v1  ;;  %s755_s25 = scalar_lea.vmem %s817_s0, %s602_s22  ;;  %v614_v12 = vld [vmem:[%s818_s1 + $0x10] sm:$0xff]  ;;  %v613_v16 = vld [vmem:[%s818_s1 + $0x8] sm:$0xff]  ;;  %v612_v17 = vld [vmem:[%s818_s1] sm:$0xff]  ;;  %s802_s20 = scalar_lea.vmem %s820_s3, %s603_s17 }
   0xf   : > { %v606_v4 = vld [vmem:[%s755_s25 + $0x14] sm:$0xf]  ;;  %v540_v5 = vld [vmem:[%s755_s25 + $0x18] sm:$0xf0]  ;;  %v604_v7 = vld [vmem:[%s755_s25 + $0x4] sm:$0xf] }
  0x10   : > { %v543_v6 = vor.u32 %v606_v4, %v540_v5  ;;  %v532_v8 = vld [vmem:[%s755_s25 + $0x8] sm:$0xf0]  ;;  %v608_v13 = vld [vmem:[%s755_s25 + $0x24] sm:$0xf]  ;;  %v530_v18 = vld [vmem:[%s755_s25] sm:$0xf] }
  0x11   : > { %348 = vmatpush.bf16.msra.mxu0 %v618_v2  ;;  %645 = vmatpush.bf16.msra.mxu2 %v618_v2  ;;  %v535_v10 = vor.u32 %v604_v7, %v532_v8  ;;  %v548_v14 = vld [vmem:[%s755_s25 + $0x28] sm:$0xf0]  ;;  %v605_v19 = vld [vmem:[%s755_s25 + $0x4] sm:$0xf0]  ;;  %v546_v20 = vld [vmem:[%s755_s25 + $0x20] sm:$0xf] }
  0x12   : > { %597 = vmatmul.msk.bf16.vlgmr.msra.gmra.mxu3 %vm334_vm0, %v543_v6  ;;  %v551_v15 = vor.u32 %v608_v13, %v548_v14  ;;  %v609_v21 = vld [vmem:[%s755_s25 + $0x24] sm:$0xf0]  ;;  %v531_v22 = vor.u32 %v605_v19, %v530_v18  ;;  %v610_v24 = vld [vmem:[%s755_s25 + $0x34] sm:$0xf]  ;;  %v556_v25 = vld [vmem:[%s755_s25 + $0x38] sm:$0xf0] }
  0x13   : > { %596 = vmatmul.msk.bf16.vlgmr.msra.gmra.mxu1 %vm334_vm0, %v535_v10  ;;  %v547_v23 = vor.u32 %v609_v21, %v546_v20  ;;  %v559_v26 = vor.u32 %v610_v24, %v556_v25  ;;  %v538_v27 = vld [vmem:[%s755_s25 + $0x10] sm:$0xf]  ;;  %v607_v28 = vld [vmem:[%s755_s25 + $0x14] sm:$0xf0]  ;;  %v677_v37 = vld [vmem:[%s819_s2] ss:$0 sm:$0xff] }
  0x14   : > { %v554_v29 = vld [vmem:[%s755_s25 + $0x30] sm:$0xf]  ;;  %v611_v30 = vld [vmem:[%s755_s25 + $0x34] sm:$0xf0]  ;;  %v539_v31 = vor.u32 %v607_v28, %v538_v27 }
  0x15   : > { %349 = vmatpush.bf16.msra.mxu0 %v617_v3  ;;  %646 = vmatpush.bf16.msra.mxu2 %v617_v3  ;;  %v555_v32 = vor.u32 %v611_v30, %v554_v29 }
  0x19   : > { %350 = vmatpush.bf16.msra.mxu0 %v616_v9  ;;  %647 = vmatpush.bf16.msra.mxu2 %v616_v9 }
  0x1d   : > { %351 = vmatpush.bf16.msra.mxu0 %v615_v11  ;;  %648 = vmatpush.bf16.msra.mxu2 %v615_v11 }
  0x21   : > { %352 = vmatpush.bf16.msra.mxu0 %v614_v12  ;;  %649 = vmatpush.bf16.msra.mxu2 %v614_v12 }
  0x22   : > { %598 = vmatmul.msk.bf16.gmra.mxu3 %vm334_vm0, %v551_v15 }
  0x25   : > { %353 = vmatpush.bf16.msra.mxu0 %v613_v16  ;;  %650 = vmatpush.bf16.msra.mxu2 %v613_v16 }
  0x29   : > { %354 = vmatpush.bf16.msra.mxu0 %v612_v17  ;;  %651 = vmatpush.bf16.msra.mxu2 %v612_v17 }
  0x2c   : > { %355 = vmatmul.bf16.vlgmr.msra.gmra.mxu0 %v531_v22  ;;  %365 = vmatmul.bf16.vlgmr.msra.gmra.mxu2 %v547_v23 }
  0x32   : > { %599 = vmatmul.msk.bf16.gmra.mxu3 %vm334_vm0, %v559_v26 }
  0x3c   : > { %360 = vmatmul.bf16.gmra.mxu0 %v539_v31  ;;  %370 = vmatmul.bf16.gmra.mxu2 %v555_v32 }
  0x90   : > { %v385_v35 = vpop.f32.mrf.mxu1 }
  0x95   : > { %v390_v33 = vpop.f32.mrf.mxu3 }
  0x98   : > { %v387_v42 = vpop.f32.mrf.mxu1 }
  0x9d   : > { %v392_v34 = vpop.f32.mrf.mxu3 }
  0xa5   : > { %v395_v38 = vpop.f32.mrf.mxu3 }
  0xa9   : > { %v356_v36 = vpop.f32.mrf.mxu0 }
  0xaa   : > { %v357_v39 = vadd.f32 %v677_v37, %v356_v36 }
  0xac   : > { %v386_v43 = vadd.f32 %v385_v35, %v357_v39 }
  0xad   : > { %v397_v47 = vpop.f32.mrf.mxu3 }
  0xae   : > { %v405_v48 = vmax.f32 %v386_v43, 0.0 }
  0xaf   : > { %v366_v40 = vpop.f32.mrf.mxu2 }
  0xb0   : > { %v367_v45 = vadd.f32 %v677_v37, %v366_v40 }
  0xb1   : > { %v358_v41 = vpop.f32.mrf.mxu0 }
  0xb2   : > { %v359_v44 = vadd.f32 %v677_v37, %v358_v41  ;;  %v396_v51 = vadd.f32 %v395_v38, %v367_v45 }
  0xb4   : > { %v388_v46 = vadd.f32 %v387_v42, %v359_v44  ;;  %v409_v56 = vmax.f32 %v396_v51, 0.0 }
  0xb5   : > { %v400_v60 = vpop.f32.mrf.mxu3 }
  0xb6   : > { %v406_v49 = vmax.f32 %v388_v46, 0.0 }
  0xb7   : > { %v368_v50 = vpop.f32.mrf.mxu2 }
  0xb8   : > { %v624_v52 = vpack.c.bf16 %v406_v49, %v405_v48  ;;  %v369_v53 = vadd.f32 %v677_v37, %v368_v50 }
  0xb9   : > { %v361_v54 = vpop.f32.mrf.mxu0 }
  0xba   : > { %625 = vst [vmem:[%s802_s20] sm:$0xff] %v624_v52   ;;  %v398_v55 = vadd.f32 %v397_v47, %v369_v53  ;;  %v362_v59 = vadd.f32 %v677_v37, %v361_v54 }
  0xbc   : > { %v410_v57 = vmax.f32 %v398_v55, 0.0  ;;  %v391_v63 = vadd.f32 %v390_v33, %v362_v59 }
  0xbd   : > { %v402_v9 = vpop.f32.mrf.mxu3 }
  0xbe   : > { %v634_v58 = vpack.c.bf16 %v410_v57, %v409_v56  ;;  %v407_v3 = vmax.f32 %v391_v63, 0.0 }
  0xbf   : > { %v371_v61 = vpop.f32.mrf.mxu2 }
  0xc0   : > { %642 = vst [vmem:[%s802_s20 + $0x10] sm:$0xff] %v634_v58   ;;  %v372_v1 = vadd.f32 %v677_v37, %v371_v61 }
  0xc1   : > { %v363_v62 = vpop.f32.mrf.mxu0 }
  0xc2   : > { %v364_v0 = vadd.f32 %v677_v37, %v363_v62  ;;  %v401_v6 = vadd.f32 %v400_v60, %v372_v1 }
  0xc4   : > { %v393_v2 = vadd.f32 %v392_v34, %v364_v0  ;;  %v411_v11 = vmax.f32 %v401_v6, 0.0 }
  0xc6   : > { %v408_v4 = vmax.f32 %v393_v2, 0.0 }
  0xc7   : > { %v373_v5 = vpop.f32.mrf.mxu2 }
  0xc8   : > { %v629_v7 = vpack.c.bf16 %v408_v4, %v407_v3  ;;  %v374_v8 = vadd.f32 %v677_v37, %v373_v5 }
  0xca   : > { %641 = vst [vmem:[%s802_s20 + $0x8] sm:$0xff] %v629_v7   ;;  %v403_v10 = vadd.f32 %v402_v9, %v374_v8 }
  0xcc   : > { %v412_v12 = vmax.f32 %v403_v10, 0.0 }
  0xce   : > { %v639_v13 = vpack.c.bf16 %v412_v12, %v411_v11 }
  0xd0   : > { %643 = vst [vmem:[%s802_s20 + $0x18] sm:$0xff] %v639_v13  }
  0xd1 PF: > { %s13_s14 = sadd.s32 1, %s700_s14   ;;  %s821_s12 = smov %s696_s13 }
  0xd2   : > { %p10_p5 = scmp.ge.s32.totalorder %s13_s14, 4   ;;  %s822_s13 = smov %s824_s15 }
  0xd4   :  { %12 = sbr.rel (!%p10_p5) target bundleno = 2 (0x2), region = 62 }

// kernel: rsu_forward.15
= control target key start
LH: loop header
LB: loop body
LE: loop exit
PB: predicated region body
PF: predicated region fallthrough
CT: control target
= control target key end

     0   :  { %s1550_s15 = smov 0   ;;  %s1552_s16 = smov 0   ;;  %s1796_s0 = inlined_call_operand.vmem [shape: bf16[2,256,144], index: 0, kind: input, shape index: {}]   ;;  %s1797_s1 = inlined_call_operand.vmem [shape: bf16[144,128], index: 1, kind: input, shape index: {}]   ;;  %s1798_s2 = inlined_call_operand.vmem [shape: f32[1,128], index: 2, kind: input, shape index: {}]   ;;  %s1799_s3 = inlined_call_operand.vmem [shape: bf16[2,256,128], index: 3, kind: input, shape index: {}]   ;;  %s1800_s4 = inlined_call_operand.vmem [shape: bf16[2,256,128], index: 4, kind: output, shape index: {}]  }
   0x1   :  { %s1554_s17 = smov 0  }
   0x2 LB: > { %s26_s18 = sadd.s32 1, %s1519_s16  ;;  %p1060_p0 = scmp.ge.s32.totalorder %s1523_s17, 1  ;;  %s1523_s17 = sphi %s1554_s17, %s14_s17   ;;  %s1519_s16 = sphi %s1552_s16, %s1802_s16   ;;  %s1515_s15 = sphi %s1550_s15, %s1801_s15  }
   0x3   : > { %p28_p1 = scmp.ge.s32.totalorder %s26_s18, 2  ;;  %p201_p2 = scmp.lt.s32.totalorder %s1523_s17, 3 }
   0x5   : > { %s1804_s18 = smov (%p28_p1, %s26_s18), 0  ;;  %p202_p3 = pnand %p1060_p0, %p201_p2 }
   0x6   : > { %p246_p4 = scmp.lt.s32.totalorder (!%p202_p3), %s1515_s15, 1 }
   0x7   : > { %205 = sbr.rel (%p202_p3) target bundleno = 307 (0x133), region = 36 }
   0xc   : > { %v1291_v0 = vld [vmem:[%s1797_s1 + $0x38] sm:$0xff]  ;;  %v1292_v1 = vld [vmem:[%s1797_s1 + $0x40] sm:$0xff]  ;;  %v1290_v2 = vld [vmem:[%s1797_s1 + $0x30] sm:$0xff]  ;;  %s1806_s15 = smov (!%p246_p4, %s1515_s15), 1  ;;  %vm529_vm0 = vcmask 130048  }
   0xd   : > { %578 = vmatpush.bf16.msra.mxu0 %v1291_v0  ;;  %1467 = vmatpush.bf16.msra.mxu2 %v1291_v0  ;;  %s1249_s25 = sshll.u32 %s1806_s15, 8  ;;  %v1289_v5 = vld [vmem:[%s1797_s1 + $0x28] sm:$0xff]  ;;  %v1288_v9 = vld [vmem:[%s1797_s1 + $0x20] sm:$0xff]  ;;  %v1287_v11 = vld [vmem:[%s1797_s1 + $0x18] sm:$0xff]  ;;  %s1250_s21 = sshll.u32 %s1806_s15, 7 }
   0xe   : > { %674 = vmatpush.bf16.msra.mxu1 %v1292_v1  ;;  %1475 = vmatpush.bf16.msra.mxu3 %v1292_v1  ;;  %s1583_s28 = scalar_lea.vmem %s1796_s0, %s1249_s25  ;;  %v1286_v12 = vld [vmem:[%s1797_s1 + $0x10] sm:$0xff]  ;;  %v1285_v16 = vld [vmem:[%s1797_s1 + $0x8] sm:$0xff]  ;;  %v1284_v19 = vld [vmem:[%s1797_s1] sm:$0xff]  ;;  %s1693_s24 = scalar_lea.vmem %s1799_s3, %s1250_s21 }
   0xf   : > { %v1252_v3 = vld [vmem:[%s1583_s28 + $0x4] sm:$0xf]  ;;  %v1071_v4 = vld [vmem:[%s1583_s28 + $0x8] sm:$0xf0]  ;;  %v1270_v7 = vld [vmem:[%s1583_s28 + $0x94] sm:$0xf]  ;;  %s1704_s26 = scalar_lea.vmem %s1800_s4, %s1250_s21 }
  0x10   : > { %v1074_v6 = vor.u32 %v1252_v3, %v1071_v4  ;;  %v1143_v8 = vld [vmem:[%s1583_s28 + $0x98] sm:$0xf0]  ;;  %v1254_v13 = vld [vmem:[%s1583_s28 + $0x14] sm:$0xf]  ;;  %v1272_v17 = vld [vmem:[%s1583_s28 + $0xa4] sm:$0xf] }
  0x11   : > { %579 = vmatpush.bf16.msra.mxu0 %v1290_v2  ;;  %1468 = vmatpush.bf16.msra.mxu2 %v1290_v2  ;;  %v1146_v10 = vor.u32 %v1270_v7, %v1143_v8  ;;  %v1079_v14 = vld [vmem:[%s1583_s28 + $0x18] sm:$0xf0]  ;;  %v1151_v18 = vld [vmem:[%s1583_s28 + $0xa8] sm:$0xf0]  ;;  %v1069_v20 = vld [vmem:[%s1583_s28] sm:$0xf] }
  0x12   : > { %1231 = vmatmul.msk.bf16.vlgmr.msra.gmra.mxu1 %vm529_vm0, %v1074_v6  ;;  %v1082_v15 = vor.u32 %v1254_v13, %v1079_v14  ;;  %v1154_v21 = vor.u32 %v1272_v17, %v1151_v18  ;;  %v1253_v22 = vld [vmem:[%s1583_s28 + $0x4] sm:$0xf0]  ;;  %v1133_v23 = vld [vmem:[%s1583_s28 + $0x80] sm:$0xf]  ;;  %v1256_v27 = vld [vmem:[%s1583_s28 + $0x24] sm:$0xf] }
  0x13   : > { %1240 = vmatmul.msk.bf16.vlgmr.msra.gmra.mxu3 %vm529_vm0, %v1146_v10  ;;  %v1269_v24 = vld [vmem:[%s1583_s28 + $0x84] sm:$0xf0]  ;;  %v1070_v25 = vor.u32 %v1253_v22, %v1069_v20  ;;  %v1087_v28 = vld [vmem:[%s1583_s28 + $0x28] sm:$0xf0]  ;;  %v1274_v30 = vld [vmem:[%s1583_s28 + $0xb4] sm:$0xf] }
  0x14   : > { %v1134_v26 = vor.u32 %v1269_v24, %v1133_v23  ;;  %v1090_v29 = vor.u32 %v1256_v27, %v1087_v28  ;;  %v1159_v31 = vld [vmem:[%s1583_s28 + $0xb8] sm:$0xf0]  ;;  %v1077_v32 = vld [vmem:[%s1583_s28 + $0x10] sm:$0xf]  ;;  %v1255_v34 = vld [vmem:[%s1583_s28 + $0x14] sm:$0xf0] }
  0x15   : > { %580 = vmatpush.bf16.msra.mxu0 %v1289_v5  ;;  %1469 = vmatpush.bf16.msra.mxu2 %v1289_v5  ;;  %v1162_v33 = vor.u32 %v1274_v30, %v1159_v31  ;;  %v1141_v35 = vld [vmem:[%s1583_s28 + $0x90] sm:$0xf]  ;;  %v1271_v36 = vld [vmem:[%s1583_s28 + $0x94] sm:$0xf0]  ;;  %v1078_v37 = vor.u32 %v1255_v34, %v1077_v32  ;;  %v1258_v39 = vld [vmem:[%s1583_s28 + $0x34] sm:$0xf] }
  0x16   : > { %v1142_v38 = vor.u32 %v1271_v36, %v1141_v35  ;;  %v1095_v40 = vld [vmem:[%s1583_s28 + $0x38] sm:$0xf0]  ;;  %v1276_v42 = vld [vmem:[%s1583_s28 + $0xc4] sm:$0xf]  ;;  %v1167_v43 = vld [vmem:[%s1583_s28 + $0xc8] sm:$0xf0] }
  0x17   : > { %v1098_v41 = vor.u32 %v1258_v39, %v1095_v40  ;;  %v1085_v44 = vld [vmem:[%s1583_s28 + $0x20] sm:$0xf]  ;;  %v1170_v45 = vor.u32 %v1276_v42, %v1167_v43  ;;  %v1257_v46 = vld [vmem:[%s1583_s28 + $0x24] sm:$0xf0]  ;;  %v1260_v51 = vld [vmem:[%s1583_s28 + $0x44] sm:$0xf] }
  0x18   : > { %v1149_v47 = vld [vmem:[%s1583_s28 + $0xa0] sm:$0xf]  ;;  %v1273_v48 = vld [vmem:[%s1583_s28 + $0xa4] sm:$0xf0]  ;;  %v1086_v49 = vor.u32 %v1257_v46, %v1085_v44  ;;  %v1103_v52 = vld [vmem:[%s1583_s28 + $0x48] sm:$0xf0] }
  0x19   : > { %581 = vmatpush.bf16.msra.mxu0 %v1288_v9  ;;  %1470 = vmatpush.bf16.msra.mxu2 %v1288_v9  ;;  %v1150_v50 = vor.u32 %v1273_v48, %v1149_v47  ;;  %v1106_v53 = vor.u32 %v1260_v51, %v1103_v52  ;;  %v1278_v54 = vld [vmem:[%s1583_s28 + $0xd4] sm:$0xf]  ;;  %v1175_v55 = vld [vmem:[%s1583_s28 + $0xd8] sm:$0xf0]  ;;  %v1093_v56 = vld [vmem:[%s1583_s28 + $0x30] sm:$0xf] }
  0x1a   : > { %v1178_v57 = vor.u32 %v1278_v54, %v1175_v55  ;;  %v1259_v58 = vld [vmem:[%s1583_s28 + $0x34] sm:$0xf0]  ;;  %v1157_v59 = vld [vmem:[%s1583_s28 + $0xb0] sm:$0xf]  ;;  %v1262_v63 = vld [vmem:[%s1583_s28 + $0x54] sm:$0xf] }
  0x1b   : > { %v1275_v60 = vld [vmem:[%s1583_s28 + $0xb4] sm:$0xf0]  ;;  %v1094_v61 = vor.u32 %v1259_v58, %v1093_v56  ;;  %v1111_v0 = vld [vmem:[%s1583_s28 + $0x58] sm:$0xf0]  ;;  %v1280_v2 = vld [vmem:[%s1583_s28 + $0xe4] sm:$0xf] }
  0x1c   : > { %v1158_v62 = vor.u32 %v1275_v60, %v1157_v59  ;;  %v1114_v1 = vor.u32 %v1262_v63, %v1111_v0  ;;  %v1183_v3 = vld [vmem:[%s1583_s28 + $0xe8] sm:$0xf0]  ;;  %v1101_v4 = vld [vmem:[%s1583_s28 + $0x40] sm:$0xf]  ;;  %v1261_v6 = vld [vmem:[%s1583_s28 + $0x44] sm:$0xf0] }
  0x1d   : > { %582 = vmatpush.bf16.msra.mxu0 %v1287_v11  ;;  %1471 = vmatpush.bf16.msra.mxu2 %v1287_v11  ;;  %v1186_v5 = vor.u32 %v1280_v2, %v1183_v3  ;;  %v1165_v7 = vld [vmem:[%s1583_s28 + $0xc0] sm:$0xf]  ;;  %v1277_v8 = vld [vmem:[%s1583_s28 + $0xc4] sm:$0xf0]  ;;  %v1102_v9 = vor.u32 %v1261_v6, %v1101_v4  ;;  %v1264_v11 = vld [vmem:[%s1583_s28 + $0x64] sm:$0xf] }
  0x1e   : > { %v1166_v10 = vor.u32 %v1277_v8, %v1165_v7  ;;  %v1282_v14 = vld [vmem:[%s1583_s28 + $0xf4] sm:$0xf]  ;;  %v1263_v18 = vld [vmem:[%s1583_s28 + $0x54] sm:$0xf0]  ;;  %v1127_v24 = vld [vmem:[%s1583_s28 + $0x78] sm:$0xf0] }
  0x1f   : > { %v1279_v20 = vld [vmem:[%s1583_s28 + $0xd4] sm:$0xf0]  ;;  %v1266_v23 = vld [vmem:[%s1583_s28 + $0x74] sm:$0xf]  ;;  %v1265_v27 = vld [vmem:[%s1583_s28 + $0x64] sm:$0xf0] }
  0x20   : > { %v1181_v28 = vld [vmem:[%s1583_s28 + $0xe0] sm:$0xf]  ;;  %v1268_v32 = vld [vmem:[%s1583_s28 + $0x84] sm:$0xf]  ;;  %v1125_v36 = vld [vmem:[%s1583_s28 + $0x70] sm:$0xf] }
  0x21   : > { %583 = vmatpush.bf16.msra.mxu0 %v1286_v12  ;;  %1472 = vmatpush.bf16.msra.mxu2 %v1286_v12  ;;  %v1119_v12 = vld [vmem:[%s1583_s28 + $0x68] sm:$0xf0]  ;;  %v1283_v39 = vld [vmem:[%s1583_s28 + $0xf4] sm:$0xf0]  ;;  %v1294_v52 = vld [vmem:[%s1693_s24] sm:$0xff]  }
  0x22   : > { %1232 = vmatmul.msk.bf16.gmra.mxu1 %vm529_vm0, %v1082_v15  ;;  %v1122_v13 = vor.u32 %v1264_v11, %v1119_v12  ;;  %v1191_v15 = vld [vmem:[%s1583_s28 + $0xf8] sm:$0xf0]  ;;  %v1296_v59 = vunpack.c.h.bf16 %v1294_v52  ;;  %v1437_v7 = vld [vmem:[%s1693_s24 + $0x8] sm:$0xff]  }
  0x23   : > { %1241 = vmatmul.msk.bf16.gmra.mxu3 %vm529_vm0, %v1154_v21  ;;  %v1194_v17 = vor.u32 %v1282_v14, %v1191_v15  ;;  %v1300_v15 = vunpack.c.h.bf16 %v1437_v7 }
  0x25   : > { %584 = vmatpush.bf16.msra.mxu0 %v1285_v16  ;;  %1473 = vmatpush.bf16.msra.mxu2 %v1285_v16  ;;  %v1109_v16 = vld [vmem:[%s1583_s28 + $0x50] sm:$0xf] }
  0x26   : > { %v1110_v21 = vor.u32 %v1263_v18, %v1109_v16  ;;  %v1445_v18 = vld [vmem:[%s1693_s24 + $0x48] sm:$0xff]  }
  0x29   : > { %585 = vmatpush.bf16.msra.mxu0 %v1284_v19  ;;  %1474 = vmatpush.bf16.msra.mxu2 %v1284_v19  ;;  %v1173_v19 = vld [vmem:[%s1583_s28 + $0xd0] sm:$0xf] }
  0x2a   : > { %v1174_v22 = vor.u32 %v1279_v20, %v1173_v19 }
  0x2c   : > { %586 = vmatmul.bf16.vlgmr.msra.gmra.mxu0 %v1070_v25  ;;  %626 = vmatmul.bf16.vlgmr.msra.gmra.mxu2 %v1134_v26  ;;  %v1130_v25 = vor.u32 %v1266_v23, %v1127_v24  ;;  %v1117_v26 = vld [vmem:[%s1583_s28 + $0x60] sm:$0xf]  ;;  %v1331_v24 = vunpack.c.l.bf16 %v1445_v18 }
  0x2d   : > { %v1118_v30 = vor.u32 %v1265_v27, %v1117_v26 }
  0x32   : > { %1233 = vmatmul.msk.bf16.gmra.mxu1 %vm529_vm0, %v1090_v29  ;;  %v1281_v29 = vld [vmem:[%s1583_s28 + $0xe4] sm:$0xf0] }
  0x33   : > { %1242 = vmatmul.msk.bf16.gmra.mxu3 %vm529_vm0, %v1162_v33  ;;  %v1182_v31 = vor.u32 %v1281_v29, %v1181_v28  ;;  %v1135_v33 = vld [vmem:[%s1583_s28 + $0x88] sm:$0xf0] }
  0x34   : > { %v1138_v34 = vor.u32 %v1268_v32, %v1135_v33 }
  0x3c   : > { %591 = vmatmul.bf16.gmra.mxu0 %v1078_v37  ;;  %631 = vmatmul.bf16.gmra.mxu2 %v1142_v38  ;;  %v1267_v37 = vld [vmem:[%s1583_s28 + $0x74] sm:$0xf0]  ;;  %v1189_v38 = vld [vmem:[%s1583_s28 + $0xf0] sm:$0xf] }
  0x3d   : > { %v1126_v40 = vor.u32 %v1267_v37, %v1125_v36 }
  0x42   : > { %1234 = vmatmul.msk.bf16.gmra.mxu1 %vm529_vm0, %v1098_v41  ;;  %v1190_v41 = vor.u32 %v1283_v39, %v1189_v38  ;;  %v1438_v39 = vld [vmem:[%s1693_s24 + $0x10] sm:$0xff]  }
  0x43   : > { %1243 = vmatmul.msk.bf16.gmra.mxu3 %vm529_vm0, %v1170_v45  ;;  %v1686_v45 = vld [vmem:[%s1798_s2] ss:$0 sm:$0xff] }
  0x4c   : > { %596 = vmatmul.bf16.gmra.mxu0 %v1086_v49  ;;  %636 = vmatmul.bf16.gmra.mxu2 %v1150_v50 }
  0x52   : > { %1235 = vmatmul.msk.bf16.gmra.mxu1 %vm529_vm0, %v1106_v53 }
  0x53   : > { %1244 = vmatmul.msk.bf16.gmra.mxu3 %vm529_vm0, %v1178_v57  ;;  %v1295_v57 = vunpack.c.l.bf16 %v1294_v52 }
  0x5c   : > { %601 = vmatmul.bf16.gmra.mxu0 %v1094_v61  ;;  %641 = vmatmul.bf16.gmra.mxu2 %v1158_v62 }
  0x62   : > { %1236 = vmatmul.msk.bf16.gmra.mxu1 %vm529_vm0, %v1114_v1 }
  0x63   : > { %1245 = vmatmul.msk.bf16.gmra.mxu3 %vm529_vm0, %v1186_v5 }
  0x6c   : > { %606 = vmatmul.bf16.gmra.mxu0 %v1102_v9  ;;  %646 = vmatmul.bf16.gmra.mxu2 %v1166_v10 }
  0x72   : > { %1237 = vmatmul.msk.bf16.gmra.mxu1 %vm529_vm0, %v1122_v13  ;;  %v1299_v13 = vunpack.c.l.bf16 %v1437_v7 }
  0x73   : > { %1246 = vmatmul.msk.bf16.gmra.mxu3 %vm529_vm0, %v1194_v17 }
  0x7c   : > { %611 = vmatmul.bf16.gmra.mxu0 %v1110_v21  ;;  %651 = vmatmul.bf16.gmra.mxu2 %v1174_v22 }
  0x82   : > { %1238 = vmatmul.msk.bf16.gmra.mxu1 %vm529_vm0, %v1130_v25 }
  0x8c   : > { %616 = vmatmul.bf16.gmra.mxu0 %v1118_v30  ;;  %656 = vmatmul.bf16.gmra.mxu2 %v1182_v31  ;;  %v1332_v30 = vunpack.c.h.bf16 %v1445_v18 }
  0x8f   : > { %v676_v35 = vpop.f32.mrf.mxu1 }
  0x92   : > { %1239 = vmatmul.msk.bf16.gmra.mxu1 %vm529_vm0, %v1138_v34 }
  0x96   : > { %v721_v44 = vpop.f32.mrf.mxu3 }
  0x97   : > { %v678_v42 = vpop.f32.mrf.mxu1 }
  0x9c   : > { %621 = vmatmul.bf16.gmra.mxu0 %v1126_v40  ;;  %661 = vmatmul.bf16.gmra.mxu2 %v1190_v41 }
  0x9e   : > { %v723_v51 = vpop.f32.mrf.mxu3 }
  0x9f   : > { %v681_v43 = vpop.f32.mrf.mxu1 }
  0xa6   : > { %v726_v3 = vpop.f32.mrf.mxu3 }
  0xa7   : > { %v683_v46 = vpop.f32.mrf.mxu1 }
  0xa9   : > { %v587_v47 = vpop.f32.mrf.mxu0 }
  0xaa   : > { %v588_v48 = vadd.f32 %v1686_v45, %v587_v47 }
  0xac   : > { %v677_v50 = vadd.f32 %v676_v35, %v588_v48  ;;  %v1304_v48 = vunpack.c.h.bf16 %v1438_v39 }
  0xae   : > { %v756_v56 = vmax.f32 %v677_v50, 0.0  ;;  %v728_v16 = vpop.f32.mrf.mxu3 }
  0xaf   : > { %v1695_v49 = vpop.f32.mrf.mxu2  ;;  %v686_v53 = vpop.f32.mrf.mxu1 }
  0xb0   : > { %v852_v62 = vadd.f32 %v1295_v57, %v756_v56 }
  0xb1   : > { %v589_v54 = vpop.f32.mrf.mxu0 }
  0xb2   : > { %v590_v55 = vadd.f32 %v1686_v45, %v589_v54 }
  0xb4   : > { %v679_v58 = vadd.f32 %v678_v42, %v590_v55 }
  0xb6   : > { %v757_v60 = vmax.f32 %v679_v58, 0.0  ;;  %v731_v35 = vpop.f32.mrf.mxu3 }
  0xb7   : > { %v1699_v61 = vpop.f32.mrf.mxu2  ;;  %v688_v0 = vpop.f32.mrf.mxu1 }
  0xb8   : > { %v853_v63 = vadd.f32 %v1296_v59, %v757_v60 }
  0xb9   : > { %v592_v1 = vpop.f32.mrf.mxu0 }
  0xba   : > { %v1360_v2 = vpack.c.bf16 %v853_v63, %v852_v62  ;;  %v593_v4 = vadd.f32 %v1686_v45, %v592_v1 }
  0xbc   : > { %1361 = vst [vmem:[%s1704_s26] sm:$0xff] %v1360_v2   ;;  %v682_v6 = vadd.f32 %v681_v43, %v593_v4 }
  0xbe   : > { %v758_v12 = vmax.f32 %v682_v6, 0.0  ;;  %v733_v57 = vpop.f32.mrf.mxu3 }
  0xbf   : > { %v632_v5 = vpop.f32.mrf.mxu2  ;;  %v1709_v8 = vpop.f32.mrf.mxu1 }
  0xc0   : > { %v633_v10 = vadd.f32 %v1686_v45, %v632_v5  ;;  %v854_v21 = vadd.f32 %v1299_v13, %v758_v12 }
  0xc1   : > { %v594_v9 = vpop.f32.mrf.mxu0 }
  0xc2   : > { %v595_v11 = vadd.f32 %v1686_v45, %v594_v9  ;;  %v722_v17 = vadd.f32 %v721_v44, %v633_v10  ;;  %v1439_v10 = vld [vmem:[%s1693_s24 + $0x18] sm:$0xff]  }
  0xc4   : > { %v684_v14 = vadd.f32 %v683_v46, %v595_v11  ;;  %v774_v27 = vmax.f32 %v722_v17, 0.0  ;;  %v1303_v46 = vunpack.c.l.bf16 %v1438_v39  ;;  %v1307_v17 = vunpack.c.l.bf16 %v1439_v10 }
  0xc6   : > { %v759_v19 = vmax.f32 %v684_v14, 0.0  ;;  %v870_v33 = vadd.f32 %v1331_v24, %v774_v27 }
  0xc7   : > { %v634_v20 = vpop.f32.mrf.mxu2  ;;  %v693_v25 = vpop.f32.mrf.mxu1 }
  0xc8   : > { %v855_v22 = vadd.f32 %v1300_v15, %v759_v19  ;;  %v635_v23 = vadd.f32 %v1686_v45, %v634_v20  ;;  %v736_v15 = vpop.f32.mrf.mxu3  ;;  %v1308_v19 = vunpack.c.h.bf16 %v1439_v10 }
  0xc9   : > { %v597_v26 = vpop.f32.mrf.mxu0 }
  0xca   : > { %v1365_v28 = vpack.c.bf16 %v855_v22, %v854_v21  ;;  %v724_v29 = vadd.f32 %v723_v51, %v635_v23  ;;  %v598_v32 = vadd.f32 %v1686_v45, %v597_v26  ;;  %v1446_v51 = vld [vmem:[%s1693_s24 + $0x50] sm:$0xff]   ;;  %v1447_v21 = vld [vmem:[%s1693_s24 + $0x58] sm:$0xff]  }
  0xcb   : > { %v1335_v58 = vunpack.c.l.bf16 %v1446_v51  ;;  %v1339_v27 = vunpack.c.l.bf16 %v1447_v21 }
  0xcc   : > { %1452 = vst [vmem:[%s1704_s26 + $0x8] sm:$0xff] %v1365_v28   ;;  %v775_v31 = vmax.f32 %v724_v29, 0.0  ;;  %v687_v38 = vadd.f32 %v686_v53, %v598_v32 }
  0xce   : > { %v871_v34 = vadd.f32 %v1332_v30, %v775_v31  ;;  %v760_v44 = vmax.f32 %v687_v38, 0.0 }
  0xcf   : > { %v637_v36 = vpop.f32.mrf.mxu2  ;;  %v1718_v40 = vpop.f32.mrf.mxu1 }
  0xd0   : > { %v1405_v37 = vpack.c.bf16 %v871_v34, %v870_v33  ;;  %v638_v42 = vadd.f32 %v1686_v45, %v637_v36  ;;  %v856_v55 = vadd.f32 %v1303_v46, %v760_v44  ;;  %v1340_v33 = vunpack.c.h.bf16 %v1447_v21 }
  0xd1   : > { %v599_v41 = vpop.f32.mrf.mxu0 }
  0xd2   : > { %1460 = vst [vmem:[%s1704_s26 + $0x48] sm:$0xff] %v1405_v37   ;;  %v600_v43 = vadd.f32 %v1686_v45, %v599_v41  ;;  %v727_v50 = vadd.f32 %v726_v3, %v638_v42  ;;  %v1440_v42 = vld [vmem:[%s1693_s24 + $0x20] sm:$0xff]  }
  0xd4   : > { %v689_v47 = vadd.f32 %v688_v0, %v600_v43  ;;  %v776_v62 = vmax.f32 %v727_v50, 0.0  ;;  %v1336_v0 = vunpack.c.h.bf16 %v1446_v51  ;;  %v1311_v50 = vunpack.c.l.bf16 %v1440_v42 }
  0xd6   : > { %v761_v52 = vmax.f32 %v689_v47, 0.0  ;;  %v872_v4 = vadd.f32 %v1335_v58, %v776_v62 }
  0xd7   : > { %v639_v54 = vpop.f32.mrf.mxu2  ;;  %v698_v59 = vpop.f32.mrf.mxu1 }
  0xd8   : > { %v857_v53 = vadd.f32 %v1304_v48, %v761_v52  ;;  %v640_v56 = vadd.f32 %v1686_v45, %v639_v54  ;;  %v1312_v52 = vunpack.c.h.bf16 %v1440_v42 }
  0xd9   : > { %v602_v60 = vpop.f32.mrf.mxu0 }
  0xda   : > { %v1370_v63 = vpack.c.bf16 %v857_v53, %v856_v55  ;;  %v729_v1 = vadd.f32 %v728_v16, %v640_v56  ;;  %v603_v3 = vadd.f32 %v1686_v45, %v602_v60  ;;  %v1448_v55 = vld [vmem:[%s1693_s24 + $0x60] sm:$0xff]  }
  0xdb   : > { %v1343_v62 = vunpack.c.l.bf16 %v1448_v55 }
  0xdc   : > { %1453 = vst [vmem:[%s1704_s26 + $0x10] sm:$0xff] %v1370_v63   ;;  %v777_v2 = vmax.f32 %v729_v1, 0.0  ;;  %v692_v9 = vadd.f32 %v1709_v8, %v603_v3 }
  0xde   : > { %v873_v5 = vadd.f32 %v1336_v0, %v777_v2  ;;  %v762_v16 = vmax.f32 %v692_v9, 0.0 }
  0xdf   : > { %v642_v6 = vpop.f32.mrf.mxu2  ;;  %v1729_v11 = vpop.f32.mrf.mxu1 }
  0xe0   : > { %v1410_v7 = vpack.c.bf16 %v873_v5, %v872_v4  ;;  %v643_v13 = vadd.f32 %v1686_v45, %v642_v6  ;;  %v858_v8 = vadd.f32 %v1307_v17, %v762_v16 }
  0xe1   : > { %v604_v12 = vpop.f32.mrf.mxu0 }
  0xe2   : > { %1461 = vst [vmem:[%s1704_s26 + $0x50] sm:$0xff] %v1410_v7   ;;  %v605_v14 = vadd.f32 %v1686_v45, %v604_v12  ;;  %v732_v20 = vadd.f32 %v731_v35, %v643_v13  ;;  %v738_v35 = vpop.f32.mrf.mxu3 }
  0xe4   : > { %v694_v18 = vadd.f32 %v693_v25, %v605_v14  ;;  %v778_v30 = vmax.f32 %v732_v20, 0.0  ;;  %v1441_v14 = vld [vmem:[%s1693_s24 + $0x28] sm:$0xff]  }
  0xe5   : > { %v1315_v20 = vunpack.c.l.bf16 %v1441_v14 }
  0xe6   : > { %v763_v22 = vmax.f32 %v694_v18, 0.0  ;;  %v874_v36 = vadd.f32 %v1339_v27, %v778_v30 }
  0xe7   : > { %v644_v23 = vpop.f32.mrf.mxu2  ;;  %v703_v28 = vpop.f32.mrf.mxu1 }
  0xe8   : > { %v859_v24 = vadd.f32 %v1308_v19, %v763_v22  ;;  %v645_v26 = vadd.f32 %v1686_v45, %v644_v23  ;;  %v1316_v22 = vunpack.c.h.bf16 %v1441_v14 }
  0xe9   : > { %v607_v29 = vpop.f32.mrf.mxu0 }
  0xea   : > { %v1375_v31 = vpack.c.bf16 %v859_v24, %v858_v8  ;;  %v734_v32 = vadd.f32 %v733_v57, %v645_v26  ;;  %v608_v34 = vadd.f32 %v1686_v45, %v607_v29  ;;  %v741_v56 = vpop.f32.mrf.mxu3  ;;  %v1449_v8 = vld [vmem:[%s1693_s24 + $0x68] sm:$0xff]  }
  0xeb   : > { %v1347_v30 = vunpack.c.l.bf16 %v1449_v8 }
  0xec   : > { %1454 = vst [vmem:[%s1704_s26 + $0x18] sm:$0xff] %v1375_v31   ;;  %v779_v25 = vmax.f32 %v734_v32, 0.0  ;;  %v697_v41 = vadd.f32 %v1718_v40, %v608_v34 }
  0xee   : > { %v875_v37 = vadd.f32 %v1340_v33, %v779_v25  ;;  %v764_v48 = vmax.f32 %v697_v41, 0.0 }
  0xef   : > { %v647_v38 = vpop.f32.mrf.mxu2  ;;  %v1740_v43 = vpop.f32.mrf.mxu1 }
  0xf0   : > { %v1415_v39 = vpack.c.bf16 %v875_v37, %v874_v36  ;;  %v648_v46 = vadd.f32 %v1686_v45, %v647_v38  ;;  %v860_v40 = vadd.f32 %v1311_v50, %v764_v48 }
  0xf1   : > { %v609_v44 = vpop.f32.mrf.mxu0 }
  0xf2   : > { %1462 = vst [vmem:[%s1704_s26 + $0x58] sm:$0xff] %v1415_v39   ;;  %v610_v47 = vadd.f32 %v1686_v45, %v609_v44  ;;  %v737_v54 = vadd.f32 %v736_v15, %v648_v46  ;;  %v743_v13 = vpop.f32.mrf.mxu3  ;;  %v1442_v46 = vld [vmem:[%s1693_s24 + $0x30] sm:$0xff]  }
  0xf4   : > { %v699_v51 = vadd.f32 %v698_v59, %v610_v47  ;;  %v780_v0 = vmax.f32 %v737_v54, 0.0  ;;  %v1344_v59 = vunpack.c.h.bf16 %v1448_v55  ;;  %v1319_v55 = vunpack.c.l.bf16 %v1442_v46 }
  0xf6   : > { %v765_v53 = vmax.f32 %v699_v51, 0.0  ;;  %v876_v6 = vadd.f32 %v1343_v62, %v780_v0 }
  0xf7   : > { %v649_v57 = vpop.f32.mrf.mxu2  ;;  %v708_v63 = vpop.f32.mrf.mxu1 }
  0xf8   : > { %v861_v58 = vadd.f32 %v1312_v52, %v765_v53  ;;  %v650_v60 = vadd.f32 %v1686_v45, %v649_v57  ;;  %v628_v52 = vadd.f32 %v1686_v45, %v1695_v49 }
  0xf9   : > { %v612_v1 = vpop.f32.mrf.mxu0 }
  0xfa   : > { %v1380_v2 = vpack.c.bf16 %v861_v58, %v860_v40  ;;  %v739_v3 = vadd.f32 %v738_v35, %v650_v60  ;;  %v613_v5 = vadd.f32 %v1686_v45, %v612_v1  ;;  %v746_v35 = vpop.f32.mrf.mxu3  ;;  %v1450_v40 = vld [vmem:[%s1693_s24 + $0x70] sm:$0xff]   ;;  %v1444_v60 = vld [vmem:[%s1693_s24 + $0x40] sm:$0xff]   ;;  %v630_v1 = vadd.f32 %v1686_v45, %v1699_v61 }
  0xfc   : > { %1455 = vst [vmem:[%s1704_s26 + $0x20] sm:$0xff] %v1380_v2   ;;  %v781_v4 = vmax.f32 %v739_v3, 0.0  ;;  %v702_v12 = vadd.f32 %v1729_v11, %v613_v5  ;;  %v1351_v3 = vunpack.c.l.bf16 %v1450_v40  ;;  %v1327_v5 = vunpack.c.l.bf16 %v1444_v60 }
  0xfe   : > { %v877_v7 = vadd.f32 %v1344_v59, %v781_v4  ;;  %v766_v19 = vmax.f32 %v702_v12, 0.0 }
  0xff   : > { %v652_v9 = vpop.f32.mrf.mxu2  ;;  %v1751_v15 = vpop.f32.mrf.mxu1 }
 0x100   : > { %v1420_v10 = vpack.c.bf16 %v877_v7, %v876_v6  ;;  %v653_v17 = vadd.f32 %v1686_v45, %v652_v9  ;;  %v862_v11 = vadd.f32 %v1315_v20, %v766_v19  ;;  %v1328_v7 = vunpack.c.h.bf16 %v1444_v60 }
 0x101   : > { %v614_v16 = vpop.f32.mrf.mxu0 }
 0x102   : > { %1463 = vst [vmem:[%s1704_s26 + $0x60] sm:$0xff] %v1420_v10   ;;  %v615_v18 = vadd.f32 %v1686_v45, %v614_v16  ;;  %v742_v23 = vadd.f32 %v741_v56, %v653_v17  ;;  %v1320_v56 = vunpack.c.h.bf16 %v1442_v46  ;;  %v748_v58 = vpop.f32.mrf.mxu3 }
 0x104   : > { %v704_v21 = vadd.f32 %v703_v28, %v615_v18  ;;  %v782_v33 = vmax.f32 %v742_v23, 0.0  ;;  %v1348_v28 = vunpack.c.h.bf16 %v1449_v8 }
 0x106   : > { %v767_v24 = vmax.f32 %v704_v21, 0.0  ;;  %v878_v38 = vadd.f32 %v1347_v30, %v782_v33 }
 0x107   : > { %v654_v26 = vpop.f32.mrf.mxu2  ;;  %v1758_v31 = vpop.f32.mrf.mxu1 }
 0x108   : > { %v863_v27 = vadd.f32 %v1316_v22, %v767_v24  ;;  %v655_v29 = vadd.f32 %v1686_v45, %v654_v26 }
 0x109   : > { %v617_v32 = vpop.f32.mrf.mxu0 }
 0x10a   : > { %v1385_v25 = vpack.c.bf16 %v863_v27, %v862_v11  ;;  %v744_v34 = vadd.f32 %v743_v13, %v655_v29  ;;  %v618_v37 = vadd.f32 %v1686_v45, %v617_v32  ;;  %v751_v22 = vpop.f32.mrf.mxu3  ;;  %v1443_v11 = vld [vmem:[%s1693_s24 + $0x38] sm:$0xff]  }
 0x10b   : > { %v1323_v33 = vunpack.c.l.bf16 %v1443_v11 }
 0x10c   : > { %1456 = vst [vmem:[%s1704_s26 + $0x28] sm:$0xff] %v1385_v25   ;;  %v783_v36 = vmax.f32 %v744_v34, 0.0  ;;  %v707_v44 = vadd.f32 %v1740_v43, %v618_v37  ;;  %v1324_v34 = vunpack.c.h.bf16 %v1443_v11 }
 0x10e   : > { %v879_v39 = vadd.f32 %v1348_v28, %v783_v36  ;;  %v768_v54 = vmax.f32 %v707_v44, 0.0 }
 0x10f   : > { %v657_v41 = vpop.f32.mrf.mxu2  ;;  %v716_v48 = vpop.f32.mrf.mxu1 }
 0x110   : > { %v1425_v42 = vpack.c.bf16 %v879_v39, %v878_v38  ;;  %v658_v47 = vadd.f32 %v1686_v45, %v657_v41  ;;  %v717_v43 = vadd.f32 %v716_v48, %v628_v52  ;;  %v864_v2 = vadd.f32 %v1319_v55, %v768_v54 }
 0x111   : > { %v619_v50 = vpop.f32.mrf.mxu0 }
 0x112   : > { %1464 = vst [vmem:[%s1704_s26 + $0x68] sm:$0xff] %v1425_v42   ;;  %v620_v51 = vadd.f32 %v1686_v45, %v619_v50  ;;  %v747_v57 = vadd.f32 %v746_v35, %v658_v47  ;;  %v772_v10 = vmax.f32 %v717_v43, 0.0  ;;  %v1451_v35 = vld [vmem:[%s1693_s24 + $0x78] sm:$0xff]   ;;  %v753_v42 = vpop.f32.mrf.mxu3 }
 0x113   : > { %v1355_v41 = vunpack.c.l.bf16 %v1451_v35  ;;  %v1356_v48 = vunpack.c.h.bf16 %v1451_v35 }
 0x114   : > { %v709_v53 = vadd.f32 %v708_v63, %v620_v51  ;;  %v784_v4 = vmax.f32 %v747_v57, 0.0  ;;  %v1352_v63 = vunpack.c.h.bf16 %v1450_v40  ;;  %v868_v19 = vadd.f32 %v1327_v5, %v772_v10 }
 0x116   : > { %v769_v62 = vmax.f32 %v709_v53, 0.0  ;;  %v880_v18 = vadd.f32 %v1351_v3, %v784_v4 }
 0x117   : > { %v659_v0 = vpop.f32.mrf.mxu2  ;;  %v718_v6 = vpop.f32.mrf.mxu1 }
 0x118   : > { %v865_v59 = vadd.f32 %v1320_v56, %v769_v62  ;;  %v660_v49 = vadd.f32 %v1686_v45, %v659_v0  ;;  %v719_v14 = vadd.f32 %v718_v6, %v630_v1 }
 0x119   : > { %v622_v9 = vpop.f32.mrf.mxu0 }
 0x11a   : > { %v1390_v12 = vpack.c.bf16 %v865_v59, %v864_v2  ;;  %v749_v13 = vadd.f32 %v748_v58, %v660_v49  ;;  %v773_v16 = vmax.f32 %v719_v14, 0.0  ;;  %v623_v17 = vadd.f32 %v1686_v45, %v622_v9 }
 0x11c   : > { %1457 = vst [vmem:[%s1704_s26 + $0x30] sm:$0xff] %v1390_v12   ;;  %v785_v61 = vmax.f32 %v749_v13, 0.0  ;;  %v869_v21 = vadd.f32 %v1328_v7, %v773_v16  ;;  %v712_v26 = vadd.f32 %v1751_v15, %v623_v17 }
 0x11e   : > { %v881_v20 = vadd.f32 %v1352_v63, %v785_v61  ;;  %v1400_v24 = vpack.c.bf16 %v869_v21, %v868_v19  ;;  %v770_v32 = vmax.f32 %v712_v26, 0.0 }
 0x11f   : > { %v662_v23 = vpop.f32.mrf.mxu2 }
 0x120   : > { %v1430_v8 = vpack.c.bf16 %v881_v20, %v880_v18  ;;  %v663_v29 = vadd.f32 %v1686_v45, %v662_v23  ;;  %1459 = vst [vmem:[%s1704_s26 + $0x40] sm:$0xff] %v1400_v24   ;;  %v866_v15 = vadd.f32 %v1323_v33, %v770_v32 }
 0x121   : > { %v624_v27 = vpop.f32.mrf.mxu0 }
 0x122   : > { %1465 = vst [vmem:[%s1704_s26 + $0x70] sm:$0xff] %v1430_v8   ;;  %v625_v30 = vadd.f32 %v1686_v45, %v624_v27  ;;  %v752_v28 = vadd.f32 %v751_v22, %v663_v29 }
 0x124   : > { %v714_v25 = vadd.f32 %v1758_v31, %v625_v30  ;;  %v786_v44 = vmax.f32 %v752_v28, 0.0 }
 0x126   : > { %v771_v36 = vmax.f32 %v714_v25, 0.0  ;;  %v882_v51 = vadd.f32 %v1355_v41, %v786_v44 }
 0x127   : > { %v664_v37 = vpop.f32.mrf.mxu2 }
 0x128   : > { %v867_v38 = vadd.f32 %v1324_v34, %v771_v36  ;;  %v665_v39 = vadd.f32 %v1686_v45, %v664_v37 }
 0x12a   : > { %v1395_v46 = vpack.c.bf16 %v867_v38, %v866_v15  ;;  %v754_v47 = vadd.f32 %v753_v42, %v665_v39 }
 0x12c   : > { %1458 = vst [vmem:[%s1704_s26 + $0x38] sm:$0xff] %v1395_v46   ;;  %v787_v50 = vmax.f32 %v754_v47, 0.0 }
 0x12e   : > { %v883_v31 = vadd.f32 %v1356_v48, %v787_v50 }
 0x130   : > { %v1435_v52 = vpack.c.bf16 %v883_v31, %v882_v51 }
 0x132   : > { %1466 = vst [vmem:[%s1704_s26 + $0x78] sm:$0xff] %v1435_v52  }
 0x133 PF: > { %s14_s17 = sadd.s32 1, %s1523_s17   ;;  %s1801_s15 = smov %s1519_s16 }
 0x134   : > { %p11_p5 = scmp.ge.s32.totalorder %s14_s17, 4   ;;  %s1802_s16 = smov %s1804_s18 }
 0x136   :  { %13 = sbr.rel (!%p11_p5) target bundleno = 2 (0x2), region = 69 }

</bundles_post_ra>
